<compile_context>
chip_gen: v6e
topology: v6e:2x2x1
jax: 0.10.0
libtpu: 0.0.40
codegen_flags: <defaults>
</compile_context>

<pallas_src>
import functools

import jax
import jax.numpy as jnp
from jax.experimental import pallas as pl
from jax.experimental.pallas import tpu as pltpu

EPS = 1e-5
LANE = 128

# Input dtype for the big patch matmuls.  float32 keeps near-exact PyTorch-f32
# semantics (tolerance ~1e-4 below); flip to jnp.bfloat16 on v6e/v7x for 2x MXU
# throughput and half the patch DMA bytes (re-validate tolerance per
# generation).  The cast happens in the wrapper, before pallas_call.
MXU_DTYPE = jnp.float32


def _round_up(x, m):
    return (x + m - 1) // m * m


# ----------------------------- Pallas kernel --------------------------------

def _make_kernel(use_fold, has_res, res_sign):
    """patches @ W + b -> InstanceNorm2d (biased var, eps=1e-5) -> PReLU
       [-> +/- residual].  One grid step == one sample (full spatial extent
       resident), so the IN statistics are plain row reductions."""

    def kernel(*refs):
        it = iter(refs)
        p_ref = next(it)                       # (P, K)   this sample's patches
        w_ref = next(it)                       # (K, Cp)  lane-padded weights
        b_ref = next(it)                       # (1, Cp)  lane-padded bias
        if use_fold:
            rr_ref = next(it)                  # (Cp, Cg) fold phase groups -> channels (/=groups)
            rb_ref = next(it)                  # (Cg, Cp) broadcast channel stats back
        a_ref = next(it)                       # (1, 1)   PReLU slope (SMEM)
        if has_res:
            r_ref = next(it)                   # (P, Cp)  residual
        o_ref = next(it)                       # (P, Cp)

        y = jnp.dot(p_ref[...], w_ref[...],
                    preferred_element_type=jnp.float32) + b_ref[...]

        # InstanceNorm2d statistics over this sample's spatial positions
        # (rows; plus the 16 lane phase-groups for the phase-packed deconv).
        if use_fold:
            mu = jnp.dot(
                jnp.mean(jnp.dot(y, rr_ref[...],
                                 preferred_element_type=jnp.float32),
                         axis=0, keepdims=True),
                rb_ref[...], preferred_element_type=jnp.float32)
        else:
            mu = jnp.mean(y, axis=0, keepdims=True)
        yc = y - mu
        if use_fold:
            var = jnp.dot(
                jnp.mean(jnp.dot(yc * yc, rr_ref[...],
                                 preferred_element_type=jnp.float32),
                         axis=0, keepdims=True),
                rb_ref[...], preferred_element_type=jnp.float32)
        else:
            var = jnp.mean(yc * yc, axis=0, keepdims=True)
        yn = yc * jax.lax.rsqrt(var + EPS)

        alpha = a_ref[0, 0]                    # SMEM scalar PReLU slope
        out = jnp.where(yn >= 0, yn, alpha * yn)
        if has_res:
            out = out + res_sign * r_ref[...]
        o_ref[...] = out

    return kernel


# ------------------------------ Pallas wrapper ------------------------------

def fused_conv_block(patches, w_mat, bias, alpha, *, rr=None, rb=None,
                     residual=None, res_sign=1.0):
    """One pallas_call, grid=(N,) 'parallel':
       per-sample  patches @ W + b -> InstanceNorm2d -> PReLU [-> +/- residual].

    patches : (N, P, K)   per-sample im2col rows
    w_mat   : (K, C)      conv matrix; lane-padded to (K, Cp), Cp % 128 == 0
    bias    : (C,)
    rr / rb : optional (C, Cg) / (Cg, C) phase fold / broadcast (deconv path)
    residual: optional (N, P, <=Cp), added (res_sign=+1) / subtracted (-1)
    returns : (N, P, Cp) float32; caller slices [:, :, :C].
    """
    N, P, K = patches.shape
    C = w_mat.shape[1]
    Cp = _round_up(C, LANE)                    # lane-dense output columns
    use_fold = rr is not None
    has_res = residual is not None

    # Cast MXU operands at the call boundary (halves DMA bytes when bf16).
    patches = patches.astype(MXU_DTYPE)
    w_p = jnp.pad(w_mat.astype(jnp.float32),
                  ((0, 0), (0, Cp - C))).astype(MXU_DTYPE)
    b_p = jnp.pad(bias.astype(jnp.float32).reshape(-1),
                  (0, Cp - C)).reshape(1, Cp)

    args = [patches, w_p, b_p]
    in_specs = [
        pl.BlockSpec((None, P, K), lambda n: (n, 0, 0)),
        pl.BlockSpec((K, Cp), lambda n: (0, 0)),
        pl.BlockSpec((1, Cp), lambda n: (0, 0)),
    ]
    Cg = 0
    if use_fold:
        Cg = rr.shape[1]
        rr_p = jnp.pad(rr.astype(jnp.float32), ((0, Cp - C), (0, 0)))
        rb_p = jnp.pad(rb.astype(jnp.float32), ((0, 0), (0, Cp - C)))
        args += [rr_p, rb_p]
        in_specs += [pl.BlockSpec((Cp, Cg), lambda n: (0, 0)),
                     pl.BlockSpec((Cg, Cp), lambda n: (0, 0))]

    args.append(jnp.asarray(alpha, jnp.float32).reshape(1, 1))
    in_specs.append(pl.BlockSpec((1, 1), lambda n: (0, 0),
                                 memory_space=pltpu.MemorySpace.SMEM))

    if has_res:
        r = residual.astype(jnp.float32)
        if r.shape[-1] < Cp:
            r = jnp.pad(r, ((0, 0), (0, 0), (0, Cp - r.shape[-1])))
        args.append(r)
        in_specs.append(pl.BlockSpec((None, P, Cp), lambda n: (n, 0, 0)))

    out_specs = pl.BlockSpec((None, P, Cp), lambda n: (n, 0, 0))
    out_shape = jax.ShapeDtypeStruct((N, P, Cp), jnp.float32)

    # Advisory cost estimate so XLA schedules the surrounding glue sensibly.
    itemsize = jnp.dtype(MXU_DTYPE).itemsize
    flops = 2 * N * P * K * Cp + 4 * N * P * Cp * Cg + 10 * N * P * Cp
    bytes_accessed = (patches.size * itemsize + w_p.size * itemsize
                      + b_p.size * 4
                      + ((rr_p.size + rb_p.size) * 4 if use_fold else 0)
                      + (args[-1].size * 4 if has_res else 0)
                      + N * P * Cp * 4)
    cost = pl.CostEstimate(flops=int(flops), transcendentals=int(N * Cp),
                           bytes_accessed=int(bytes_accessed))

    # VMEM budget: double-buffered per-step tiles + resident weights + headroom;
    # stays well under v7x's 64 MiB physical VMEM.
    step_bytes = (P * K * itemsize                       # patch tile
                  + P * Cp * 4 * (2 if has_res else 1)   # out (+ residual) tile
                  + K * Cp * itemsize + 2 * Cp * 4       # weights + bias + alpha
                  + (Cp * Cg * 8 if use_fold else 0))    # rr + rb
    vmem_limit = int(min(max(4 * step_bytes + (4 << 20), 16 << 20), 60 << 20))

    kernel = _make_kernel(use_fold, has_res, float(res_sign))
    return pl.pallas_call(
        kernel,
        out_shape=out_shape,
        grid=(N,),
        in_specs=in_specs,
        out_specs=out_specs,
        compiler_params=pltpu.CompilerParams(
            dimension_semantics=("parallel",),
            vmem_limit_bytes=vmem_limit),
        cost_estimate=cost,
    )(*args)


# ------------------------------ JAX glue ------------------------------------

def im2col(x_nhwc, kh, kw, stride, pad_t, pad_b, pad_l, pad_r):
    """Returns ([N, Ho*Wo, kh*kw*C], Ho, Wo); rows ordered (oh, ow)."""
    N, H, W, C = x_nhwc.shape
    xp = jnp.pad(x_nhwc, ((0, 0), (pad_t, pad_b), (pad_l, pad_r), (0, 0)))
    Hp, Wp = H + pad_t + pad_b, W + pad_l + pad_r
    Ho = (Hp - kh) // stride + 1
    Wo = (Wp - kw) // stride + 1
    cols = []
    for i in range(kh):
        for j in range(kw):
            cols.append(xp[:, i:i + (Ho - 1) * stride + 1:stride,
                              j:j + (Wo - 1) * stride + 1:stride, :])
    patches = jnp.stack(cols, axis=3).reshape(N, Ho, Wo, kh * kw * C)
    return patches.reshape(N, Ho * Wo, kh * kw * C), Ho, Wo


def conv_weight_to_mat(w):
    """PyTorch Conv2d weight [Cout, Cin, kh, kw] -> [kh*kw*Cin, Cout]."""
    Cout, Cin, kh, kw = w.shape
    return jnp.transpose(w, (2, 3, 1, 0)).reshape(kh * kw * Cin, Cout)


def deconv_weight_phase_mat(w_t, k, s, p):
    """PyTorch ConvTranspose2d weight [Cin, Cout, k, k] -> phase-packed matrix
    [wh*wh*Cin, s*s*Cout] for the stride^2-subkernel decomposition.  Only the
    non-zero taps of the equivalent dilated conv are kept (~s^2 x fewer FLOPs
    and patch bytes).  Output column = (rh*s + rw)*Cout + cout."""
    Cin, Cout = w_t.shape[0], w_t.shape[1]
    offs = sorted({d for r in range(s) for d in range(-(k // s) - 1, k // s + 2)
                   if 0 <= r + p - s * d < k})
    dh_lo, dh_hi = offs[0], offs[-1]
    wh = dh_hi - dh_lo + 1
    zero = jnp.zeros((Cin, Cout), w_t.dtype)
    phase_cols = []
    for rh in range(s):
        for rw in range(s):
            taps = []
            for di in range(wh):
                kh = rh + p - s * (dh_lo + di)
                for dj in range(wh):
                    kw = rw + p - s * (dh_lo + dj)
                    if 0 <= kh < k and 0 <= kw < k:
                        taps.append(w_t[:, :, kh, kw])
                    else:
                        taps.append(zero)
            phase_cols.append(jnp.concatenate(taps, axis=0))   # (wh*wh*Cin, Cout)
    return jnp.concatenate(phase_cols, axis=1).astype(jnp.float32), wh, dh_lo, dh_hi


# ------------------------------ D_DownBlock ---------------------------------

def d_down_block(x_nchw, params, kernel_size=8, stride=4, padding=2):
    k, s, p = kernel_size, stride, padding
    N, Cin, H, W = x_nchw.shape
    nf = params["w0"].shape[0]
    # Phase-decomposed deconv + fused (h0 - x) rely on the DBPN geometry.
    assert k - 2 * p == s and H % s == 0 and W % s == 0, \
        "D_DownBlock requires kernel - 2*pad == stride and stride-divisible H/W"

    x_nhwc = jnp.transpose(x_nchw, (0, 2, 3, 1)).astype(jnp.float32)

    # ---- self.conv : 1x1 ConvBlock (pointwise -> no im2col needed) ----------
    p0 = x_nhwc.reshape(N, H * W, Cin)
    x_pad = fused_conv_block(p0, conv_weight_to_mat(params["w0"]),
                             params["b0"], params["a0"])
    x = x_pad[:, :, :nf].reshape(N, H, W, nf)

    # ---- down_conv1 : kxk stride-s ConvBlock --------------------------------
    p1, Hl, Wl = im2col(x, k, k, s, p, p, p, p)
    P_l = Hl * Wl
    l0_pad = fused_conv_block(p1, conv_weight_to_mat(params["w1"]),
                              params["b1"], params["a1"])
    l0 = l0_pad[:, :, :nf].reshape(N, Hl, Wl, nf)

    # ---- down_conv2 : DeconvBlock, fused with the (h0 - x) subtraction ------
    w2_mat, wh, dh_lo, dh_hi = deconv_weight_phase_mat(params["w2"], k, s, p)
    p2, _, _ = im2col(l0, wh, wh, 1, -dh_lo, dh_hi, -dh_lo, dh_hi)
    Cd = s * s * nf
    b2_full = jnp.tile(params["b2"], s * s)                     # (s*s*nf,)
    eye_c = jnp.eye(nf, dtype=jnp.float32)
    rr = jnp.tile(eye_c, (s * s, 1)) / float(s * s)             # fold 16 phases
    rb = jnp.tile(eye_c, (1, s * s))                            # broadcast back
    # x in the same phase-packed layout (space-to-depth) -> subtract in-kernel.
    x_s2d = (x.reshape(N, Hl, s, Wl, s, nf).transpose(0, 1, 3, 2, 4, 5)
             .reshape(N, P_l, Cd))
    d_pad = fused_conv_block(p2, w2_mat, b2_full, params["a2"], rr=rr, rb=rb,
                             residual=x_s2d, res_sign=-1.0)     # = h0 - x
    d = (d_pad[:, :, :Cd].reshape(N, Hl, Wl, s, s, nf).transpose(0, 1, 3, 2, 4, 5)
         .reshape(N, H, W, nf))                                 # depth-to-space

    # ---- down_conv3 : kxk stride-s ConvBlock, fused with "+ l0" -------------
    p3, _, _ = im2col(d, k, k, s, p, p, p, p)
    out_pad = fused_conv_block(p3, conv_weight_to_mat(params["w3"]),
                               params["b3"], params["a3"],
                               residual=l0_pad, res_sign=1.0)   # = l1 + l0
    out = out_pad[:, :, :nf].reshape(N, Hl, Wl, nf)
    return jnp.transpose(out, (0, 3, 1, 2))


# ------------------------------ pure-JAX reference ---------------------------

def _ref_conv_block(x, w, b, alpha, stride, pad):
    y = jax.lax.conv_general_dilated(
        x, jnp.transpose(w, (2, 3, 1, 0)),
        window_strides=(stride, stride), padding=[(pad, pad), (pad, pad)],
        dimension_numbers=("NHWC", "HWIO", "NHWC"),
        precision=jax.lax.Precision.HIGHEST)
    y = y + b.reshape(1, 1, 1, -1)
    mean = jnp.mean(y, axis=(1, 2), keepdims=True)
    var = jnp.mean(jnp.square(y - mean), axis=(1, 2), keepdims=True)
    yn = (y - mean) * jax.lax.rsqrt(var + EPS)
    return jnp.where(yn >= 0, yn, alpha * yn)


def _ref_deconv_block(x, w_t, b, alpha, k, stride, pad):
    w_eq = jnp.flip(jnp.transpose(w_t, (1, 0, 2, 3)), axis=(2, 3))
    y = jax.lax.conv_general_dilated(
        x, jnp.transpose(w_eq, (2, 3, 1, 0)),
        window_strides=(1, 1), padding=[(k - 1 - pad, k - 1 - pad)] * 2,
        lhs_dilation=(stride, stride),
        dimension_numbers=("NHWC", "HWIO", "NHWC"),
        precision=jax.lax.Precision.HIGHEST)
    y = y + b.reshape(1, 1, 1, -1)
    mean = jnp.mean(y, axis=(1, 2), keepdims=True)
    var = jnp.mean(jnp.square(y - mean), axis=(1, 2), keepdims=True)
    yn = (y - mean) * jax.lax.rsqrt(var + EPS)
    return jnp.where(yn >= 0, yn, alpha * yn)


def d_down_block_ref(x_nchw, params, k=8, s=4, p=2):
    x = jnp.transpose(x_nchw, (0, 2, 3, 1)).astype(jnp.float32)
    x = _ref_conv_block(x, params["w0"], params["b0"], params["a0"], 1, 0)
    l0 = _ref_conv_block(x, params["w1"], params["b1"], params["a1"], s, p)
    h0 = _ref_deconv_block(l0, params["w2"], params["b2"], params["a2"], k, s, p)
    l1 = _ref_conv_block(h0 - x, params["w3"], params["b3"], params["a3"], s, p)
    return jnp.transpose(l1 + l0, (0, 3, 1, 2))


# ------------------------------ params / main --------------------------------

def init_params(key, num_filter, num_stages=1, kernel_size=8):
    ks = jax.random.split(key, 8)
    nf, k = num_filter, kernel_size
    return {
        # ConvBlock(nf*num_stages -> nf, 1x1)
        "w0": 0.10 * jax.random.normal(ks[0], (nf, nf * num_stages, 1, 1), jnp.float32),
        "b0": 0.10 * jax.random.normal(ks[1], (nf,), jnp.float32),
        "a0": jnp.float32(0.25),
        # down_conv1: ConvBlock(nf -> nf, k, s, p)
        "w1": 0.05 * jax.random.normal(ks[2], (nf, nf, k, k), jnp.float32),
        "b1": 0.10 * jax.random.normal(ks[3], (nf,), jnp.float32),
        "a1": jnp.float32(0.25),
        # down_conv2: DeconvBlock(nf -> nf, k, s, p); ConvTranspose2d weight [Cin,Cout,k,k]
        "w2": 0.05 * jax.random.normal(ks[4], (nf, nf, k, k), jnp.float32),
        "b2": 0.10 * jax.random.normal(ks[5], (nf,), jnp.float32),
        "a2": jnp.float32(0.25),
        # down_conv3: ConvBlock(nf -> nf, k, s, p)
        "w3": 0.05 * jax.random.normal(ks[6], (nf, nf, k, k), jnp.float32),
        "b3": 0.10 * jax.random.normal(ks[7], (nf,), jnp.float32),
        "a3": jnp.float32(0.25),
    }


if __name__ == "__main__":
    num_filter, num_stages = 8, 1
    N, H, W = 2, 16, 16

    key = jax.random.PRNGKey(0)
    k_params, k_x = jax.random.split(key)
    params = init_params(k_params, num_filter, num_stages)

    # NCHW input, channels = num_filter * num_stages
    x = jax.random.normal(k_x, (N, num_filter * num_stages, H, W), jnp.float32)

    out = jax.block_until_ready(jax.jit(d_down_block)(x, params))

    # kernel 8, stride 4, pad 2  ->  spatial / 4
    assert out.shape == (N, num_filter, H // 4, W // 4), out.shape
    assert bool(jnp.all(jnp.isfinite(out)))

    # Cross-check against a pure-JAX (lax.conv, HIGHEST precision) reference.
    # Tolerance tightened ~50-500x vs. the previous 5e-2 (all-f32 path); rtol
    # absorbs transcendental (rsqrt) implementation differences Mosaic vs XLA.
    ref = jax.block_until_ready(jax.jit(d_down_block_ref)(x, params))
    max_err = float(jnp.max(jnp.abs(out - ref)))
    assert bool(jnp.allclose(out, ref, rtol=1e-3, atol=1e-4)), max_err

    print("KERNEL_OK")
</pallas_src>

<mosaic_0001>
module attributes {stable_mosaic.version = 11 : i64} {
  func.func @kernel(%arg0: i32, %arg1: memref<1x256x8xf32, #tpu.memory_space<vmem>>, %arg2: memref<8x128xf32, #tpu.memory_space<vmem>>, %arg3: memref<1x128xf32, #tpu.memory_space<vmem>>, %arg4: memref<1x1xf32, #tpu.memory_space<smem>>, %arg5: memref<1x256x128xf32, #tpu.memory_space<vmem>>) attributes {dimension_semantics = [#tpu.dimension_semantics<parallel>], iteration_bounds = array<i64: 2>, scalar_prefetch = 0 : i64, scratch_operands = 0 : i64, tpu.core_type = #tpu.core_type<tc>, window_params = [{transform_indices = @transform_0, window_bounds = array<i64: 1, 256, 8>}, {pipeline_mode = #tpu.pipeline_mode<synchronous>, transform_indices = @transform_1, window_bounds = array<i64: 8, 128>}, {pipeline_mode = #tpu.pipeline_mode<synchronous>, transform_indices = @transform_2, window_bounds = array<i64: 1, 128>}, {transform_indices = @transform_3, window_bounds = array<i64: 1, 1>}, {transform_indices = @transform_4, window_bounds = array<i64: 1, 256, 128>}]} {
    %c0 = arith.constant 0 : index
    %c0_0 = arith.constant 0 : index
    %c0_1 = arith.constant 0 : index
    %0 = vector.load %arg1[%c0, %c0_0, %c0_1] : memref<1x256x8xf32, #tpu.memory_space<vmem>>, vector<1x256x8xf32>
    %1 = vector.shape_cast %0 : vector<1x256x8xf32> to vector<256x8xf32>
    %c0_2 = arith.constant 0 : index
    %c0_3 = arith.constant 0 : index
    %2 = vector.load %arg2[%c0_2, %c0_3] : memref<8x128xf32, #tpu.memory_space<vmem>>, vector<8x128xf32>
    %cst = arith.constant dense<0.000000e+00> : vector<256x128xf32>
    %3 = tpu.matmul %1, %2, %cst {dimension_numbers = #tpu.dot_dimension_numbers<[1], [0], [0], [1], [0, 0, 1, 1], [], []>} : vector<256x8xf32>, vector<8x128xf32>, vector<256x128xf32> -> vector<256x128xf32>
    %c0_4 = arith.constant 0 : index
    %c0_5 = arith.constant 0 : index
    %4 = vector.load %arg3[%c0_4, %c0_5] : memref<1x128xf32, #tpu.memory_space<vmem>>, vector<1x128xf32>
    %5 = vector.broadcast %4 : vector<1x128xf32> to vector<256x128xf32>
    %6 = arith.addf %3, %5 : vector<256x128xf32>
    %cst_6 = arith.constant dense<0.000000e+00> : vector<128xf32>
    %7 = vector.multi_reduction <add>, %6, %cst_6 [0] : vector<256x128xf32> to vector<128xf32>
    %8 = vector.shape_cast %7 : vector<128xf32> to vector<1x128xf32>
    %cst_7 = arith.constant 2.560000e+02 : f32
    %9 = vector.broadcast %cst_7 : f32 to vector<1x128xf32>
    %10 = arith.divf %8, %9 : vector<1x128xf32>
    %11 = vector.broadcast %10 : vector<1x128xf32> to vector<256x128xf32>
    %12 = arith.subf %6, %11 : vector<256x128xf32>
    %13 = arith.mulf %12, %12 : vector<256x128xf32>
    %cst_8 = arith.constant dense<0.000000e+00> : vector<128xf32>
    %14 = vector.multi_reduction <add>, %13, %cst_8 [0] : vector<256x128xf32> to vector<128xf32>
    %15 = vector.shape_cast %14 : vector<128xf32> to vector<1x128xf32>
    %cst_9 = arith.constant 2.560000e+02 : f32
    %16 = vector.broadcast %cst_9 : f32 to vector<1x128xf32>
    %17 = arith.divf %15, %16 : vector<1x128xf32>
    %cst_10 = arith.constant 9.99999974E-6 : f32
    %18 = vector.broadcast %cst_10 : f32 to vector<1x128xf32>
    %19 = arith.addf %17, %18 : vector<1x128xf32>
    %20 = math.rsqrt %19 : vector<1x128xf32>
    %21 = vector.broadcast %20 : vector<1x128xf32> to vector<256x128xf32>
    %22 = arith.mulf %12, %21 : vector<256x128xf32>
    %c0_11 = arith.constant 0 : index
    %c0_12 = arith.constant 0 : index
    %23 = memref.load %arg4[%c0_11, %c0_12] : memref<1x1xf32, #tpu.memory_space<smem>>
    %cst_13 = arith.constant 0.000000e+00 : f32
    %24 = vector.broadcast %cst_13 : f32 to vector<256x128xf32>
    %25 = arith.cmpf oge, %22, %24 : vector<256x128xf32>
    %26 = vector.broadcast %23 : f32 to vector<256x128xf32>
    %27 = arith.mulf %26, %22 : vector<256x128xf32>
    %28 = arith.select %25, %22, %27 : vector<256x128xi1>, vector<256x128xf32>
    %c0_14 = arith.constant 0 : index
    %c0_15 = arith.constant 0 : index
    %c0_16 = arith.constant 0 : index
    %29 = vector.load %arg5[%c0_14, %c0_15, %c0_16] : memref<1x256x128xf32, #tpu.memory_space<vmem>>, vector<1x256x128xf32>
    %30 = vector.shape_cast %29 : vector<1x256x128xf32> to vector<256x128xf32>
    %31 = vector.shape_cast %28 : vector<256x128xf32> to vector<1x256x128xf32>
    tpu.vector_store %arg5[%c0_14, %c0_15, %c0_16], %31 {strides = array<i32>} : memref<1x256x128xf32, #tpu.memory_space<vmem>>, vector<1x256x128xf32>,
    return
  }
  func.func @transform_0(%arg0: i32) -> (i32, i32, i32) {
    %c0_i32 = arith.constant 0 : i32
    %c0_i32_0 = arith.constant 0 : i32
    %c0_i32_1 = arith.constant 0 : i32
    return %arg0, %c0_i32, %c0_i32_0 : i32, i32, i32
  }
  func.func @transform_1(%arg0: i32) -> (i32, i32) {
    %c0_i32 = arith.constant 0 : i32
    %c0_i32_0 = arith.constant 0 : i32
    %c0_i32_1 = arith.constant 0 : i32
    return %c0_i32, %c0_i32_0 : i32, i32
  }
  func.func @transform_2(%arg0: i32) -> (i32, i32) {
    %c0_i32 = arith.constant 0 : i32
    %c0_i32_0 = arith.constant 0 : i32
    %c0_i32_1 = arith.constant 0 : i32
    return %c0_i32, %c0_i32_0 : i32, i32
  }
  func.func @transform_3(%arg0: i32) -> (i32, i32) {
    %c0_i32 = arith.constant 0 : i32
    %c0_i32_0 = arith.constant 0 : i32
    %c0_i32_1 = arith.constant 0 : i32
    return %c0_i32, %c0_i32_0 : i32, i32
  }
  func.func @transform_4(%arg0: i32) -> (i32, i32, i32) {
    %c0_i32 = arith.constant 0 : i32
    %c0_i32_0 = arith.constant 0 : i32
    %c0_i32_1 = arith.constant 0 : i32
    return %arg0, %c0_i32, %c0_i32_0 : i32, i32, i32
  }
}

module attributes {stable_mosaic.version = 11 : i64} {
  func.func @kernel(%arg0: i32, %arg1: memref<1x16x512xf32, #tpu.memory_space<vmem>>, %arg2: memref<512x128xf32, #tpu.memory_space<vmem>>, %arg3: memref<1x128xf32, #tpu.memory_space<vmem>>, %arg4: memref<1x1xf32, #tpu.memory_space<smem>>, %arg5: memref<1x16x128xf32, #tpu.memory_space<vmem>>) attributes {dimension_semantics = [#tpu.dimension_semantics<parallel>], iteration_bounds = array<i64: 2>, scalar_prefetch = 0 : i64, scratch_operands = 0 : i64, tpu.core_type = #tpu.core_type<tc>, window_params = [{transform_indices = @transform_0, window_bounds = array<i64: 1, 16, 512>}, {pipeline_mode = #tpu.pipeline_mode<synchronous>, transform_indices = @transform_1, window_bounds = array<i64: 512, 128>}, {pipeline_mode = #tpu.pipeline_mode<synchronous>, transform_indices = @transform_2, window_bounds = array<i64: 1, 128>}, {transform_indices = @transform_3, window_bounds = array<i64: 1, 1>}, {transform_indices = @transform_4, window_bounds = array<i64: 1, 16, 128>}]} {
    %c0 = arith.constant 0 : index
    %c0_0 = arith.constant 0 : index
    %c0_1 = arith.constant 0 : index
    %0 = vector.load %arg1[%c0, %c0_0, %c0_1] : memref<1x16x512xf32, #tpu.memory_space<vmem>>, vector<1x16x512xf32>
    %1 = vector.shape_cast %0 : vector<1x16x512xf32> to vector<16x512xf32>
    %c0_2 = arith.constant 0 : index
    %c0_3 = arith.constant 0 : index
    %2 = vector.load %arg2[%c0_2, %c0_3] : memref<512x128xf32, #tpu.memory_space<vmem>>, vector<512x128xf32>
    %cst = arith.constant dense<0.000000e+00> : vector<16x128xf32>
    %3 = tpu.matmul %1, %2, %cst {dimension_numbers = #tpu.dot_dimension_numbers<[1], [0], [0], [1], [0, 0, 1, 1], [], []>} : vector<16x512xf32>, vector<512x128xf32>, vector<16x128xf32> -> vector<16x128xf32>
    %c0_4 = arith.constant 0 : index
    %c0_5 = arith.constant 0 : index
    %4 = vector.load %arg3[%c0_4, %c0_5] : memref<1x128xf32, #tpu.memory_space<vmem>>, vector<1x128xf32>
    %5 = vector.broadcast %4 : vector<1x128xf32> to vector<16x128xf32>
    %6 = arith.addf %3, %5 : vector<16x128xf32>
    %cst_6 = arith.constant dense<0.000000e+00> : vector<128xf32>
    %7 = vector.multi_reduction <add>, %6, %cst_6 [0] : vector<16x128xf32> to vector<128xf32>
    %8 = vector.shape_cast %7 : vector<128xf32> to vector<1x128xf32>
    %cst_7 = arith.constant 1.600000e+01 : f32
    %9 = vector.broadcast %cst_7 : f32 to vector<1x128xf32>
    %10 = arith.divf %8, %9 : vector<1x128xf32>
    %11 = vector.broadcast %10 : vector<1x128xf32> to vector<16x128xf32>
    %12 = arith.subf %6, %11 : vector<16x128xf32>
    %13 = arith.mulf %12, %12 : vector<16x128xf32>
    %cst_8 = arith.constant dense<0.000000e+00> : vector<128xf32>
    %14 = vector.multi_reduction <add>, %13, %cst_8 [0] : vector<16x128xf32> to vector<128xf32>
    %15 = vector.shape_cast %14 : vector<128xf32> to vector<1x128xf32>
    %cst_9 = arith.constant 1.600000e+01 : f32
    %16 = vector.broadcast %cst_9 : f32 to vector<1x128xf32>
    %17 = arith.divf %15, %16 : vector<1x128xf32>
    %cst_10 = arith.constant 9.99999974E-6 : f32
    %18 = vector.broadcast %cst_10 : f32 to vector<1x128xf32>
    %19 = arith.addf %17, %18 : vector<1x128xf32>
    %20 = math.rsqrt %19 : vector<1x128xf32>
    %21 = vector.broadcast %20 : vector<1x128xf32> to vector<16x128xf32>
    %22 = arith.mulf %12, %21 : vector<16x128xf32>
    %c0_11 = arith.constant 0 : index
    %c0_12 = arith.constant 0 : index
    %23 = memref.load %arg4[%c0_11, %c0_12] : memref<1x1xf32, #tpu.memory_space<smem>>
    %cst_13 = arith.constant 0.000000e+00 : f32
    %24 = vector.broadcast %cst_13 : f32 to vector<16x128xf32>
    %25 = arith.cmpf oge, %22, %24 : vector<16x128xf32>
    %26 = vector.broadcast %23 : f32 to vector<16x128xf32>
    %27 = arith.mulf %26, %22 : vector<16x128xf32>
    %28 = arith.select %25, %22, %27 : vector<16x128xi1>, vector<16x128xf32>
    %c0_14 = arith.constant 0 : index
    %c0_15 = arith.constant 0 : index
    %c0_16 = arith.constant 0 : index
    %29 = vector.load %arg5[%c0_14, %c0_15, %c0_16] : memref<1x16x128xf32, #tpu.memory_space<vmem>>, vector<1x16x128xf32>
    %30 = vector.shape_cast %29 : vector<1x16x128xf32> to vector<16x128xf32>
    %31 = vector.shape_cast %28 : vector<16x128xf32> to vector<1x16x128xf32>
    tpu.vector_store %arg5[%c0_14, %c0_15, %c0_16], %31 {strides = array<i32>} : memref<1x16x128xf32, #tpu.memory_space<vmem>>, vector<1x16x128xf32>,
    return
  }
  func.func @transform_0(%arg0: i32) -> (i32, i32, i32) {
    %c0_i32 = arith.constant 0 : i32
    %c0_i32_0 = arith.constant 0 : i32
    %c0_i32_1 = arith.constant 0 : i32
    return %arg0, %c0_i32, %c0_i32_0 : i32, i32, i32
  }
  func.func @transform_1(%arg0: i32) -> (i32, i32) {
    %c0_i32 = arith.constant 0 : i32
    %c0_i32_0 = arith.constant 0 : i32
    %c0_i32_1 = arith.constant 0 : i32
    return %c0_i32, %c0_i32_0 : i32, i32
  }
  func.func @transform_2(%arg0: i32) -> (i32, i32) {
    %c0_i32 = arith.constant 0 : i32
    %c0_i32_0 = arith.constant 0 : i32
    %c0_i32_1 = arith.constant 0 : i32
    return %c0_i32, %c0_i32_0 : i32, i32
  }
  func.func @transform_3(%arg0: i32) -> (i32, i32) {
    %c0_i32 = arith.constant 0 : i32
    %c0_i32_0 = arith.constant 0 : i32
    %c0_i32_1 = arith.constant 0 : i32
    return %c0_i32, %c0_i32_0 : i32, i32
  }
  func.func @transform_4(%arg0: i32) -> (i32, i32, i32) {
    %c0_i32 = arith.constant 0 : i32
    %c0_i32_0 = arith.constant 0 : i32
    %c0_i32_1 = arith.constant 0 : i32
    return %arg0, %c0_i32, %c0_i32_0 : i32, i32, i32
  }
}

module attributes {stable_mosaic.version = 11 : i64} {
  func.func @kernel(%arg0: i32, %arg1: memref<1x16x72xf32, #tpu.memory_space<vmem>>, %arg2: memref<72x128xf32, #tpu.memory_space<vmem>>, %arg3: memref<1x128xf32, #tpu.memory_space<vmem>>, %arg4: memref<128x8xf32, #tpu.memory_space<vmem>>, %arg5: memref<8x128xf32, #tpu.memory_space<vmem>>, %arg6: memref<1x1xf32, #tpu.memory_space<smem>>, %arg7: memref<1x16x128xf32, #tpu.memory_space<vmem>>, %arg8: memref<1x16x128xf32, #tpu.memory_space<vmem>>) attributes {dimension_semantics = [#tpu.dimension_semantics<parallel>], iteration_bounds = array<i64: 2>, scalar_prefetch = 0 : i64, scratch_operands = 0 : i64, tpu.core_type = #tpu.core_type<tc>, window_params = [{transform_indices = @transform_0, window_bounds = array<i64: 1, 16, 72>}, {pipeline_mode = #tpu.pipeline_mode<synchronous>, transform_indices = @transform_1, window_bounds = array<i64: 72, 128>}, {pipeline_mode = #tpu.pipeline_mode<synchronous>, transform_indices = @transform_2, window_bounds = array<i64: 1, 128>}, {pipeline_mode = #tpu.pipeline_mode<synchronous>, transform_indices = @transform_3, window_bounds = array<i64: 128, 8>}, {pipeline_mode = #tpu.pipeline_mode<synchronous>, transform_indices = @transform_4, window_bounds = array<i64: 8, 128>}, {transform_indices = @transform_5, window_bounds = array<i64: 1, 1>}, {transform_indices = @transform_6, window_bounds = array<i64: 1, 16, 128>}, {transform_indices = @transform_7, window_bounds = array<i64: 1, 16, 128>}]} {
    %c0 = arith.constant 0 : index
    %c0_0 = arith.constant 0 : index
    %c0_1 = arith.constant 0 : index
    %0 = vector.load %arg1[%c0, %c0_0, %c0_1] : memref<1x16x72xf32, #tpu.memory_space<vmem>>, vector<1x16x72xf32>
    %1 = vector.shape_cast %0 : vector<1x16x72xf32> to vector<16x72xf32>
    %c0_2 = arith.constant 0 : index
    %c0_3 = arith.constant 0 : index
    %2 = vector.load %arg2[%c0_2, %c0_3] : memref<72x128xf32, #tpu.memory_space<vmem>>, vector<72x128xf32>
    %cst = arith.constant dense<0.000000e+00> : vector<16x128xf32>
    %3 = tpu.matmul %1, %2, %cst {dimension_numbers = #tpu.dot_dimension_numbers<[1], [0], [0], [1], [0, 0, 1, 1], [], []>} : vector<16x72xf32>, vector<72x128xf32>, vector<16x128xf32> -> vector<16x128xf32>
    %c0_4 = arith.constant 0 : index
    %c0_5 = arith.constant 0 : index
    %4 = vector.load %arg3[%c0_4, %c0_5] : memref<1x128xf32, #tpu.memory_space<vmem>>, vector<1x128xf32>
    %5 = vector.broadcast %4 : vector<1x128xf32> to vector<16x128xf32>
    %6 = arith.addf %3, %5 : vector<16x128xf32>
    %c0_6 = arith.constant 0 : index
    %c0_7 = arith.constant 0 : index
    %7 = vector.load %arg4[%c0_6, %c0_7] : memref<128x8xf32, #tpu.memory_space<vmem>>, vector<128x8xf32>
    %cst_8 = arith.constant dense<0.000000e+00> : vector<16x8xf32>
    %8 = tpu.matmul %6, %7, %cst_8 {dimension_numbers = #tpu.dot_dimension_numbers<[1], [0], [0], [1], [0, 0, 1, 1], [], []>} : vector<16x128xf32>, vector<128x8xf32>, vector<16x8xf32> -> vector<16x8xf32>
    %cst_9 = arith.constant dense<0.000000e+00> : vector<8xf32>
    %9 = vector.multi_reduction <add>, %8, %cst_9 [0] : vector<16x8xf32> to vector<8xf32>
    %10 = vector.shape_cast %9 : vector<8xf32> to vector<1x8xf32>
    %cst_10 = arith.constant 1.600000e+01 : f32
    %11 = vector.broadcast %cst_10 : f32 to vector<1x8xf32>
    %12 = arith.divf %10, %11 : vector<1x8xf32>
    %c0_11 = arith.constant 0 : index
    %c0_12 = arith.constant 0 : index
    %13 = vector.load %arg5[%c0_11, %c0_12] : memref<8x128xf32, #tpu.memory_space<vmem>>, vector<8x128xf32>
    %cst_13 = arith.constant dense<0.000000e+00> : vector<1x128xf32>
    %14 = tpu.matmul %12, %13, %cst_13 {dimension_numbers = #tpu.dot_dimension_numbers<[1], [0], [0], [1], [0, 0, 1, 1], [], []>} : vector<1x8xf32>, vector<8x128xf32>, vector<1x128xf32> -> vector<1x128xf32>
    %15 = vector.broadcast %14 : vector<1x128xf32> to vector<16x128xf32>
    %16 = arith.subf %6, %15 : vector<16x128xf32>
    %17 = arith.mulf %16, %16 : vector<16x128xf32>
    %c0_14 = arith.constant 0 : index
    %c0_15 = arith.constant 0 : index
    %18 = vector.load %arg4[%c0_14, %c0_15] : memref<128x8xf32, #tpu.memory_space<vmem>>, vector<128x8xf32>
    %cst_16 = arith.constant dense<0.000000e+00> : vector<16x8xf32>
    %19 = tpu.matmul %17, %18, %cst_16 {dimension_numbers = #tpu.dot_dimension_numbers<[1], [0], [0], [1], [0, 0, 1, 1], [], []>} : vector<16x128xf32>, vector<128x8xf32>, vector<16x8xf32> -> vector<16x8xf32>
    %cst_17 = arith.constant dense<0.000000e+00> : vector<8xf32>
    %20 = vector.multi_reduction <add>, %19, %cst_17 [0] : vector<16x8xf32> to vector<8xf32>
    %21 = vector.shape_cast %20 : vector<8xf32> to vector<1x8xf32>
    %cst_18 = arith.constant 1.600000e+01 : f32
    %22 = vector.broadcast %cst_18 : f32 to vector<1x8xf32>
    %23 = arith.divf %21, %22 : vector<1x8xf32>
    %c0_19 = arith.constant 0 : index
    %c0_20 = arith.constant 0 : index
    %24 = vector.load %arg5[%c0_19, %c0_20] : memref<8x128xf32, #tpu.memory_space<vmem>>, vector<8x128xf32>
    %cst_21 = arith.constant dense<0.000000e+00> : vector<1x128xf32>
    %25 = tpu.matmul %23, %24, %cst_21 {dimension_numbers = #tpu.dot_dimension_numbers<[1], [0], [0], [1], [0, 0, 1, 1], [], []>} : vector<1x8xf32>, vector<8x128xf32>, vector<1x128xf32> -> vector<1x128xf32>
    %cst_22 = arith.constant 9.99999974E-6 : f32
    %26 = vector.broadcast %cst_22 : f32 to vector<1x128xf32>
    %27 = arith.addf %25, %26 : vector<1x128xf32>
    %28 = math.rsqrt %27 : vector<1x128xf32>
    %29 = vector.broadcast %28 : vector<1x128xf32> to vector<16x128xf32>
    %30 = arith.mulf %16, %29 : vector<16x128xf32>
    %c0_23 = arith.constant 0 : index
    %c0_24 = arith.constant 0 : index
    %31 = memref.load %arg6[%c0_23, %c0_24] : memref<1x1xf32, #tpu.memory_space<smem>>
    %cst_25 = arith.constant 0.000000e+00 : f32
    %32 = vector.broadcast %cst_25 : f32 to vector<16x128xf32>
    %33 = arith.cmpf oge, %30, %32 : vector<16x128xf32>
    %34 = vector.broadcast %31 : f32 to vector<16x128xf32>
    %35 = arith.mulf %34, %30 : vector<16x128xf32>
    %36 = arith.select %33, %30, %35 : vector<16x128xi1>, vector<16x128xf32>
    %c0_26 = arith.constant 0 : index
    %c0_27 = arith.constant 0 : index
    %c0_28 = arith.constant 0 : index
    %37 = vector.load %arg7[%c0_26, %c0_27, %c0_28] : memref<1x16x128xf32, #tpu.memory_space<vmem>>, vector<1x16x128xf32>
    %38 = vector.shape_cast %37 : vector<1x16x128xf32> to vector<16x128xf32>
    %cst_29 = arith.constant -1.000000e+00 : f32
    %39 = vector.broadcast %cst_29 : f32 to vector<16x128xf32>
    %40 = arith.mulf %39, %38 : vector<16x128xf32>
    %41 = arith.addf %36, %40 : vector<16x128xf32>
    %c0_30 = arith.constant 0 : index
    %c0_31 = arith.constant 0 : index
    %c0_32 = arith.constant 0 : index
    %42 = vector.load %arg8[%c0_30, %c0_31, %c0_32] : memref<1x16x128xf32, #tpu.memory_space<vmem>>, vector<1x16x128xf32>
    %43 = vector.shape_cast %42 : vector<1x16x128xf32> to vector<16x128xf32>
    %44 = vector.shape_cast %41 : vector<16x128xf32> to vector<1x16x128xf32>
    tpu.vector_store %arg8[%c0_30, %c0_31, %c0_32], %44 {strides = array<i32>} : memref<1x16x128xf32, #tpu.memory_space<vmem>>, vector<1x16x128xf32>,
    return
  }
  func.func @transform_0(%arg0: i32) -> (i32, i32, i32) {
    %c0_i32 = arith.constant 0 : i32
    %c0_i32_0 = arith.constant 0 : i32
    %c0_i32_1 = arith.constant 0 : i32
    return %arg0, %c0_i32, %c0_i32_0 : i32, i32, i32
  }
  func.func @transform_1(%arg0: i32) -> (i32, i32) {
    %c0_i32 = arith.constant 0 : i32
    %c0_i32_0 = arith.constant 0 : i32
    %c0_i32_1 = arith.constant 0 : i32
    return %c0_i32, %c0_i32_0 : i32, i32
  }
  func.func @transform_2(%arg0: i32) -> (i32, i32) {
    %c0_i32 = arith.constant 0 : i32
    %c0_i32_0 = arith.constant 0 : i32
    %c0_i32_1 = arith.constant 0 : i32
    return %c0_i32, %c0_i32_0 : i32, i32
  }
  func.func @transform_3(%arg0: i32) -> (i32, i32) {
    %c0_i32 = arith.constant 0 : i32
    %c0_i32_0 = arith.constant 0 : i32
    %c0_i32_1 = arith.constant 0 : i32
    return %c0_i32, %c0_i32_0 : i32, i32
  }
  func.func @transform_4(%arg0: i32) -> (i32, i32) {
    %c0_i32 = arith.constant 0 : i32
    %c0_i32_0 = arith.constant 0 : i32
    %c0_i32_1 = arith.constant 0 : i32
    return %c0_i32, %c0_i32_0 : i32, i32
  }
  func.func @transform_5(%arg0: i32) -> (i32, i32) {
    %c0_i32 = arith.constant 0 : i32
    %c0_i32_0 = arith.constant 0 : i32
    %c0_i32_1 = arith.constant 0 : i32
    return %c0_i32, %c0_i32_0 : i32, i32
  }
  func.func @transform_6(%arg0: i32) -> (i32, i32, i32) {
    %c0_i32 = arith.constant 0 : i32
    %c0_i32_0 = arith.constant 0 : i32
    %c0_i32_1 = arith.constant 0 : i32
    return %arg0, %c0_i32, %c0_i32_0 : i32, i32, i32
  }
  func.func @transform_7(%arg0: i32) -> (i32, i32, i32) {
    %c0_i32 = arith.constant 0 : i32
    %c0_i32_0 = arith.constant 0 : i32
    %c0_i32_1 = arith.constant 0 : i32
    return %arg0, %c0_i32, %c0_i32_0 : i32, i32, i32
  }
}

module attributes {stable_mosaic.version = 11 : i64} {
  func.func @kernel(%arg0: i32, %arg1: memref<1x16x512xf32, #tpu.memory_space<vmem>>, %arg2: memref<512x128xf32, #tpu.memory_space<vmem>>, %arg3: memref<1x128xf32, #tpu.memory_space<vmem>>, %arg4: memref<1x1xf32, #tpu.memory_space<smem>>, %arg5: memref<1x16x128xf32, #tpu.memory_space<vmem>>, %arg6: memref<1x16x128xf32, #tpu.memory_space<vmem>>) attributes {dimension_semantics = [#tpu.dimension_semantics<parallel>], iteration_bounds = array<i64: 2>, scalar_prefetch = 0 : i64, scratch_operands = 0 : i64, tpu.core_type = #tpu.core_type<tc>, window_params = [{transform_indices = @transform_0, window_bounds = array<i64: 1, 16, 512>}, {pipeline_mode = #tpu.pipeline_mode<synchronous>, transform_indices = @transform_1, window_bounds = array<i64: 512, 128>}, {pipeline_mode = #tpu.pipeline_mode<synchronous>, transform_indices = @transform_2, window_bounds = array<i64: 1, 128>}, {transform_indices = @transform_3, window_bounds = array<i64: 1, 1>}, {transform_indices = @transform_4, window_bounds = array<i64: 1, 16, 128>}, {transform_indices = @transform_5, window_bounds = array<i64: 1, 16, 128>}]} {
    %c0 = arith.constant 0 : index
    %c0_0 = arith.constant 0 : index
    %c0_1 = arith.constant 0 : index
    %0 = vector.load %arg1[%c0, %c0_0, %c0_1] : memref<1x16x512xf32, #tpu.memory_space<vmem>>, vector<1x16x512xf32>
    %1 = vector.shape_cast %0 : vector<1x16x512xf32> to vector<16x512xf32>
    %c0_2 = arith.constant 0 : index
    %c0_3 = arith.constant 0 : index
    %2 = vector.load %arg2[%c0_2, %c0_3] : memref<512x128xf32, #tpu.memory_space<vmem>>, vector<512x128xf32>
    %cst = arith.constant dense<0.000000e+00> : vector<16x128xf32>
    %3 = tpu.matmul %1, %2, %cst {dimension_numbers = #tpu.dot_dimension_numbers<[1], [0], [0], [1], [0, 0, 1, 1], [], []>} : vector<16x512xf32>, vector<512x128xf32>, vector<16x128xf32> -> vector<16x128xf32>
    %c0_4 = arith.constant 0 : index
    %c0_5 = arith.constant 0 : index
    %4 = vector.load %arg3[%c0_4, %c0_5] : memref<1x128xf32, #tpu.memory_space<vmem>>, vector<1x128xf32>
    %5 = vector.broadcast %4 : vector<1x128xf32> to vector<16x128xf32>
    %6 = arith.addf %3, %5 : vector<16x128xf32>
    %cst_6 = arith.constant dense<0.000000e+00> : vector<128xf32>
    %7 = vector.multi_reduction <add>, %6, %cst_6 [0] : vector<16x128xf32> to vector<128xf32>
    %8 = vector.shape_cast %7 : vector<128xf32> to vector<1x128xf32>
    %cst_7 = arith.constant 1.600000e+01 : f32
    %9 = vector.broadcast %cst_7 : f32 to vector<1x128xf32>
    %10 = arith.divf %8, %9 : vector<1x128xf32>
    %11 = vector.broadcast %10 : vector<1x128xf32> to vector<16x128xf32>
    %12 = arith.subf %6, %11 : vector<16x128xf32>
    %13 = arith.mulf %12, %12 : vector<16x128xf32>
    %cst_8 = arith.constant dense<0.000000e+00> : vector<128xf32>
    %14 = vector.multi_reduction <add>, %13, %cst_8 [0] : vector<16x128xf32> to vector<128xf32>
    %15 = vector.shape_cast %14 : vector<128xf32> to vector<1x128xf32>
    %cst_9 = arith.constant 1.600000e+01 : f32
    %16 = vector.broadcast %cst_9 : f32 to vector<1x128xf32>
    %17 = arith.divf %15, %16 : vector<1x128xf32>
    %cst_10 = arith.constant 9.99999974E-6 : f32
    %18 = vector.broadcast %cst_10 : f32 to vector<1x128xf32>
    %19 = arith.addf %17, %18 : vector<1x128xf32>
    %20 = math.rsqrt %19 : vector<1x128xf32>
    %21 = vector.broadcast %20 : vector<1x128xf32> to vector<16x128xf32>
    %22 = arith.mulf %12, %21 : vector<16x128xf32>
    %c0_11 = arith.constant 0 : index
    %c0_12 = arith.constant 0 : index
    %23 = memref.load %arg4[%c0_11, %c0_12] : memref<1x1xf32, #tpu.memory_space<smem>>
    %cst_13 = arith.constant 0.000000e+00 : f32
    %24 = vector.broadcast %cst_13 : f32 to vector<16x128xf32>
    %25 = arith.cmpf oge, %22, %24 : vector<16x128xf32>
    %26 = vector.broadcast %23 : f32 to vector<16x128xf32>
    %27 = arith.mulf %26, %22 : vector<16x128xf32>
    %28 = arith.select %25, %22, %27 : vector<16x128xi1>, vector<16x128xf32>
    %c0_14 = arith.constant 0 : index
    %c0_15 = arith.constant 0 : index
    %c0_16 = arith.constant 0 : index
    %29 = vector.load %arg5[%c0_14, %c0_15, %c0_16] : memref<1x16x128xf32, #tpu.memory_space<vmem>>, vector<1x16x128xf32>
    %30 = vector.shape_cast %29 : vector<1x16x128xf32> to vector<16x128xf32>
    %cst_17 = arith.constant 1.000000e+00 : f32
    %31 = vector.broadcast %cst_17 : f32 to vector<16x128xf32>
    %32 = arith.mulf %31, %30 : vector<16x128xf32>
    %33 = arith.addf %28, %32 : vector<16x128xf32>
    %c0_18 = arith.constant 0 : index
    %c0_19 = arith.constant 0 : index
    %c0_20 = arith.constant 0 : index
    %34 = vector.load %arg6[%c0_18, %c0_19, %c0_20] : memref<1x16x128xf32, #tpu.memory_space<vmem>>, vector<1x16x128xf32>
    %35 = vector.shape_cast %34 : vector<1x16x128xf32> to vector<16x128xf32>
    %36 = vector.shape_cast %33 : vector<16x128xf32> to vector<1x16x128xf32>
    tpu.vector_store %arg6[%c0_18, %c0_19, %c0_20], %36 {strides = array<i32>} : memref<1x16x128xf32, #tpu.memory_space<vmem>>, vector<1x16x128xf32>,
    return
  }
  func.func @transform_0(%arg0: i32) -> (i32, i32, i32) {
    %c0_i32 = arith.constant 0 : i32
    %c0_i32_0 = arith.constant 0 : i32
    %c0_i32_1 = arith.constant 0 : i32
    return %arg0, %c0_i32, %c0_i32_0 : i32, i32, i32
  }
  func.func @transform_1(%arg0: i32) -> (i32, i32) {
    %c0_i32 = arith.constant 0 : i32
    %c0_i32_0 = arith.constant 0 : i32
    %c0_i32_1 = arith.constant 0 : i32
    return %c0_i32, %c0_i32_0 : i32, i32
  }
  func.func @transform_2(%arg0: i32) -> (i32, i32) {
    %c0_i32 = arith.constant 0 : i32
    %c0_i32_0 = arith.constant 0 : i32
    %c0_i32_1 = arith.constant 0 : i32
    return %c0_i32, %c0_i32_0 : i32, i32
  }
  func.func @transform_3(%arg0: i32) -> (i32, i32) {
    %c0_i32 = arith.constant 0 : i32
    %c0_i32_0 = arith.constant 0 : i32
    %c0_i32_1 = arith.constant 0 : i32
    return %c0_i32, %c0_i32_0 : i32, i32
  }
  func.func @transform_4(%arg0: i32) -> (i32, i32, i32) {
    %c0_i32 = arith.constant 0 : i32
    %c0_i32_0 = arith.constant 0 : i32
    %c0_i32_1 = arith.constant 0 : i32
    return %arg0, %c0_i32, %c0_i32_0 : i32, i32, i32
  }
  func.func @transform_5(%arg0: i32) -> (i32, i32, i32) {
    %c0_i32 = arith.constant 0 : i32
    %c0_i32_0 = arith.constant 0 : i32
    %c0_i32_1 = arith.constant 0 : i32
    return %arg0, %c0_i32, %c0_i32_0 : i32, i32, i32
  }
}

</mosaic_0001>

<bundles_post_ra>
// kernel: d_down_block.4
= control target key start
LH: loop header
LB: loop body
LE: loop exit
PB: predicated region body
PF: predicated region fallthrough
CT: control target
= control target key end

     0   :  { %s1098_s17 = smov 0   ;;  %s1772_s0 = inlined_call_operand.vmem [shape: f32[2,256,8], index: 0, kind: input, shape index: {}]   ;;  %s1773_s1 = inlined_call_operand.vmem [shape: f32[8,128], index: 1, kind: input, shape index: {}]   ;;  %s1774_s2 = inlined_call_operand.vmem [shape: f32[1,128], index: 2, kind: input, shape index: {}]   ;;  %s1775_s3 = inlined_call_operand.<no memory space> [shape: f32[1,1], index: 3, kind: input, shape index: {}]   ;;  %s1776_s4 = inlined_call_operand.vmem [shape: f32[2,256,128], index: 4, kind: output, shape index: {}]  }
   0x1   :  { %9 = sst [smem:[#allocation2]] %s1775_s3 }
   0x2 LB: > { %s921_s18 = sadd.s32 4294967295, %s1068_s17   ;;  %p925_p0 = scmp.ge.s32.totalorder %s1068_s17, 1  ;;  %s1068_s17 = sphi %s1098_s17, %s15_s17  }
   0x3   : > { %p163_p1 = scmp.lt.s32.totalorder %s1068_s17, 3 }
   0x5   : > { %p164_p2 = pnand %p925_p0, %p163_p1 }
   0x7   : > { %167 = sbr.rel (%p164_p2) target bundleno = 428 (0x1ac), region = 36 }
   0xc   : > { %v231_v0 = vld [vmem:[%s1773_s1] sm:$0xff]  ;;  %p189_p3 = scmp.lt.s32.totalorder %s921_s18, 1  ;;  %vm239_vm0 = vcmask 64512   ;;  %s736_s26 = sld [smem:[#allocation2]] }
   0xd   : > { %1000 = vmatprep.subr.mxu0 %v231_v0  ;;  %1050 = vmatprep.subr.mxu1 %v231_v0  ;;  %v1186_v34 = vld [vmem:[%s1774_s2] ss:$0 sm:$0xff] }
   0xe   : > { %1001 = vmatpush3.msra.mxu0 %v231_v0  ;;  %s1814_s18 = smov (!%p189_p3, %s921_s18), 1  ;;  %1051 = vmatpush3.msra.mxu1 %v231_v0 }
   0xf   : > { %s965_s3 = sshll.u32 %s1814_s18, 8 }
  0x10   : > { %s1117_s23 = scalar_lea.vmem %s1772_s0, %s965_s3  ;;  %s1623_s29 = scalar_lea.vmem %s1776_s4, %s965_s3 }
  0x11   : > { %v199_v1 = vld [vmem:[%s1117_s23] sm:$0xff]  ;;  %v200_v2 = vld [vmem:[%s1117_s23 + $0x8] sm:$0xff]  ;;  %v201_v3 = vld [vmem:[%s1117_s23 + $0x10] sm:$0xff] }
  0x12   : > { %1002 = vmatprep.mubr.msk.f32.mxu0 %vm239_vm0, %v199_v1  ;;  %v202_v4 = vld [vmem:[%s1117_s23 + $0x18] sm:$0xff]  ;;  %v203_v5 = vld [vmem:[%s1117_s23 + $0x20] sm:$0xff]  ;;  %v216_v7 = vld [vmem:[%s1117_s23 + $0x88] sm:$0xff] }
  0x13   : > { %1003 = vmatmul.mubr.msk.f32.vlgmr.msra.gmra.mxu0 %vm239_vm0, %v200_v2  ;;  %v215_v6 = vld [vmem:[%s1117_s23 + $0x80] sm:$0xff]  ;;  %v217_v8 = vld [vmem:[%s1117_s23 + $0x90] sm:$0xff]  ;;  %v204_v9 = vld [vmem:[%s1117_s23 + $0x28] sm:$0xff] }
  0x14   : > { %1005 = vmatprep.mubr.msk.f32.mxu0 %vm239_vm0, %v201_v3  ;;  %1026 = vmatprep.mubr.msk.f32.mxu1 %vm239_vm0, %v215_v6  ;;  %v205_v10 = vld [vmem:[%s1117_s23 + $0x30] sm:$0xff]  ;;  %v218_v11 = vld [vmem:[%s1117_s23 + $0x98] sm:$0xff]  ;;  %v219_v12 = vld [vmem:[%s1117_s23 + $0xa0] sm:$0xff] }
  0x15   : > { %1027 = vmatmul.mubr.msk.f32.vlgmr.msra.gmra.mxu1 %vm239_vm0, %v216_v7  ;;  %v206_v13 = vld [vmem:[%s1117_s23 + $0x38] sm:$0xff]  ;;  %v207_v14 = vld [vmem:[%s1117_s23 + $0x40] sm:$0xff]  ;;  %v220_v15 = vld [vmem:[%s1117_s23 + $0xa8] sm:$0xff] }
  0x16   : > { %1029 = vmatprep.mubr.msk.f32.mxu1 %vm239_vm0, %v217_v8  ;;  %v221_v16 = vld [vmem:[%s1117_s23 + $0xb0] sm:$0xff]  ;;  %v208_v17 = vld [vmem:[%s1117_s23 + $0x48] sm:$0xff]  ;;  %v222_v19 = vld [vmem:[%s1117_s23 + $0xb8] sm:$0xff] }
  0x17   : > { %1006 = vmatmul.mubr.msk.f32.gmra.mxu0 %vm239_vm0, %v202_v4  ;;  %v209_v18 = vld [vmem:[%s1117_s23 + $0x50] sm:$0xff]  ;;  %v223_v20 = vld [vmem:[%s1117_s23 + $0xc0] sm:$0xff]  ;;  %v210_v21 = vld [vmem:[%s1117_s23 + $0x58] sm:$0xff] }
  0x18   : > { %1008 = vmatprep.mubr.msk.f32.mxu0 %vm239_vm0, %v203_v5  ;;  %v211_v22 = vld [vmem:[%s1117_s23 + $0x60] sm:$0xff]  ;;  %v224_v23 = vld [vmem:[%s1117_s23 + $0xc8] sm:$0xff]  ;;  %v225_v24 = vld [vmem:[%s1117_s23 + $0xd0] sm:$0xff] }
  0x19   : > { %1030 = vmatmul.mubr.msk.f32.gmra.mxu1 %vm239_vm0, %v218_v11  ;;  %v212_v25 = vld [vmem:[%s1117_s23 + $0x68] sm:$0xff]  ;;  %v213_v26 = vld [vmem:[%s1117_s23 + $0x70] sm:$0xff]  ;;  %v226_v27 = vld [vmem:[%s1117_s23 + $0xd8] sm:$0xff] }
  0x1a   : > { %1032 = vmatprep.mubr.msk.f32.mxu1 %vm239_vm0, %v219_v12  ;;  %v227_v28 = vld [vmem:[%s1117_s23 + $0xe0] sm:$0xff]  ;;  %v214_v29 = vld [vmem:[%s1117_s23 + $0x78] sm:$0xff]  ;;  %v228_v30 = vld [vmem:[%s1117_s23 + $0xe8] sm:$0xff] }
  0x1b   : > { %1009 = vmatmul.mubr.msk.f32.gmra.mxu0 %vm239_vm0, %v204_v9  ;;  %v229_v31 = vld [vmem:[%s1117_s23 + $0xf0] sm:$0xff]  ;;  %v230_v32 = vld [vmem:[%s1117_s23 + $0xf8] sm:$0xff] }
  0x1c   : > { %1011 = vmatprep.mubr.msk.f32.mxu0 %vm239_vm0, %v205_v10 }
  0x1d   : > { %1033 = vmatmul.mubr.msk.f32.gmra.mxu1 %vm239_vm0, %v220_v15 }
  0x1e   : > { %1035 = vmatprep.mubr.msk.f32.mxu1 %vm239_vm0, %v221_v16 }
  0x1f   : > { %1012 = vmatmul.mubr.msk.f32.gmra.mxu0 %vm239_vm0, %v206_v13 }
  0x20   : > { %1014 = vmatprep.mubr.msk.f32.mxu0 %vm239_vm0, %v207_v14 }
  0x21   : > { %1036 = vmatmul.mubr.msk.f32.gmra.mxu1 %vm239_vm0, %v222_v19 }
  0x22   : > { %1038 = vmatprep.mubr.msk.f32.mxu1 %vm239_vm0, %v223_v20 }
  0x23   : > { %1015 = vmatmul.mubr.msk.f32.gmra.mxu0 %vm239_vm0, %v208_v17 }
  0x24   : > { %1017 = vmatprep.mubr.msk.f32.mxu0 %vm239_vm0, %v209_v18 }
  0x25   : > { %1039 = vmatmul.mubr.msk.f32.gmra.mxu1 %vm239_vm0, %v224_v23 }
  0x26   : > { %1041 = vmatprep.mubr.msk.f32.mxu1 %vm239_vm0, %v225_v24 }
  0x27   : > { %1018 = vmatmul.mubr.msk.f32.gmra.mxu0 %vm239_vm0, %v210_v21 }
  0x28   : > { %1020 = vmatprep.mubr.msk.f32.mxu0 %vm239_vm0, %v211_v22 }
  0x29   : > { %1042 = vmatmul.mubr.msk.f32.gmra.mxu1 %vm239_vm0, %v226_v27 }
  0x2a   : > { %1044 = vmatprep.mubr.msk.f32.mxu1 %vm239_vm0, %v227_v28 }
  0x2b   : > { %1021 = vmatmul.mubr.msk.f32.gmra.mxu0 %vm239_vm0, %v212_v25 }
  0x2c   : > { %1023 = vmatprep.mubr.msk.f32.mxu0 %vm239_vm0, %v213_v26 }
  0x2d   : > { %1045 = vmatmul.mubr.msk.f32.gmra.mxu1 %vm239_vm0, %v228_v30 }
  0x2e   : > { %1047 = vmatprep.mubr.msk.f32.mxu1 %vm239_vm0, %v229_v31 }
  0x2f   : > { %1024 = vmatmul.mubr.msk.f32.gmra.mxu0 %vm239_vm0, %v214_v29 }
  0x31   : > { %1048 = vmatmul.mubr.msk.f32.gmra.mxu1 %vm239_vm0, %v230_v32 }
  0xd3   : > { %v1004_v33 = vpop.f32.mrf.mxu0 }
  0xd4   : > { %v1192_v38 = vadd.f32 %v1004_v33, %v1186_v34 }
  0xd5   : > { %v402_v35 = vpop.f32.mrf.mxu0  ;;  %v1028_v39 = vpop.f32.mrf.mxu1 }
  0xd6   : > { %v1189_v36 = vadd.f32 %v1186_v34, %v402_v35  ;;  %v1256_v28 = vadd.f32 %v1028_v39, %v1186_v34 }
  0xd7   : > { %v1007_v37 = vpop.f32.mrf.mxu0  ;;  %v482_v43 = vpop.f32.mrf.mxu1 }
  0xd8   : > { %v561_v41 = vadd.f32 %v1192_v38, %v1189_v36  ;;  %v1200_v45 = vadd.f32 %v1007_v37, %v1186_v34  ;;  %v1252_v25 = vadd.f32 %v1186_v34, %v482_v43 }
  0xd9   : > { %v412_v40 = vpop.f32.mrf.mxu0  ;;  %v1031_v47 = vpop.f32.mrf.mxu1 }
  0xda   : > { %v1197_v42 = vadd.f32 %v1186_v34, %v412_v40  ;;  %v1264_v33 = vadd.f32 %v1031_v47, %v1186_v34 }
  0xdb   : > { %v1010_v44 = vpop.f32.mrf.mxu0  ;;  %v492_v52 = vpop.f32.mrf.mxu1 }
  0xdc   : > { %v562_v46 = vadd.f32 %v561_v41, %v1197_v42  ;;  %v1208_v53 = vadd.f32 %v1010_v44, %v1186_v34  ;;  %v1260_v30 = vadd.f32 %v1186_v34, %v492_v52 }
  0xdd   : > { %v422_v48 = vpop.f32.mrf.mxu0  ;;  %v1034_v59 = vpop.f32.mrf.mxu1 }
  0xde   : > { %v1204_v49 = vadd.f32 %v1186_v34, %v422_v48  ;;  %v563_v50 = vadd.f32 %v562_v46, %v1200_v45  ;;  %v1272_v41 = vadd.f32 %v1034_v59, %v1186_v34 }
  0xdf   : > { %v1013_v51 = vpop.f32.mrf.mxu0  ;;  %v502_v2 = vpop.f32.mrf.mxu1 }
  0xe0   : > { %v564_v54 = vadd.f32 %v563_v50, %v1204_v49  ;;  %v1216_v60 = vadd.f32 %v1013_v51, %v1186_v34  ;;  %v1268_v37 = vadd.f32 %v1186_v34, %v502_v2 }
  0xe1   : > { %v432_v55 = vpop.f32.mrf.mxu0  ;;  %v1037_v9 = vpop.f32.mrf.mxu1 }
  0xe2   : > { %v1212_v56 = vadd.f32 %v1186_v34, %v432_v55  ;;  %v565_v57 = vadd.f32 %v564_v54, %v1208_v53  ;;  %v1280_v48 = vadd.f32 %v1037_v9, %v1186_v34 }
  0xe3   : > { %v1016_v58 = vpop.f32.mrf.mxu0  ;;  %v512_v16 = vpop.f32.mrf.mxu1 }
  0xe4   : > { %v566_v61 = vadd.f32 %v565_v57, %v1212_v56  ;;  %v1224_v3 = vadd.f32 %v1016_v58, %v1186_v34  ;;  %v1276_v44 = vadd.f32 %v1186_v34, %v512_v16 }
  0xe5   : > { %v442_v62 = vpop.f32.mrf.mxu0  ;;  %v1040_v22 = vpop.f32.mrf.mxu1 }
  0xe6   : > { %v1220_v63 = vadd.f32 %v1186_v34, %v442_v62  ;;  %v567_v0 = vadd.f32 %v566_v61, %v1216_v60  ;;  %v1288_v55 = vadd.f32 %v1040_v22, %v1186_v34 }
  0xe7   : > { %v1019_v1 = vpop.f32.mrf.mxu0  ;;  %v522_v27 = vpop.f32.mrf.mxu1 }
  0xe8   : > { %v568_v4 = vadd.f32 %v567_v0, %v1220_v63  ;;  %v1232_v10 = vadd.f32 %v1019_v1, %v1186_v34  ;;  %v1284_v51 = vadd.f32 %v1186_v34, %v522_v27 }
  0xe9   : > { %v452_v5 = vpop.f32.mrf.mxu0  ;;  %v1043_v32 = vpop.f32.mrf.mxu1 }
  0xea   : > { %v1228_v6 = vadd.f32 %v1186_v34, %v452_v5  ;;  %v569_v7 = vadd.f32 %v568_v4, %v1224_v3  ;;  %v1296_v62 = vadd.f32 %v1043_v32, %v1186_v34 }
  0xeb   : > { %v1022_v8 = vpop.f32.mrf.mxu0  ;;  %v532_v39 = vpop.f32.mrf.mxu1 }
  0xec   : > { %v570_v11 = vadd.f32 %v569_v7, %v1228_v6  ;;  %v1240_v17 = vadd.f32 %v1022_v8, %v1186_v34  ;;  %v1292_v58 = vadd.f32 %v1186_v34, %v532_v39 }
  0xed   : > { %v462_v12 = vpop.f32.mrf.mxu0  ;;  %v1046_v47 = vpop.f32.mrf.mxu1 }
  0xee   : > { %v1236_v13 = vadd.f32 %v1186_v34, %v462_v12  ;;  %v571_v14 = vadd.f32 %v570_v11, %v1232_v10  ;;  %v1304_v5 = vadd.f32 %v1046_v47, %v1186_v34 }
  0xef   : > { %v1025_v15 = vpop.f32.mrf.mxu0  ;;  %v542_v54 = vpop.f32.mrf.mxu1 }
  0xf0   : > { %v572_v18 = vadd.f32 %v571_v14, %v1236_v13  ;;  %v1248_v23 = vadd.f32 %v1025_v15, %v1186_v34  ;;  %v1300_v1 = vadd.f32 %v1186_v34, %v542_v54 }
  0xf1   : > { %v472_v19 = vpop.f32.mrf.mxu0  ;;  %v1049_v61 = vpop.f32.mrf.mxu1 }
  0xf2   : > { %v1244_v20 = vadd.f32 %v1186_v34, %v472_v19  ;;  %v573_v21 = vadd.f32 %v572_v18, %v1240_v17  ;;  %v1312_v11 = vadd.f32 %v1049_v61, %v1186_v34 }
  0xf3   : > { %v552_v4 = vpop.f32.mrf.mxu1 }
  0xf4   : > { %v574_v24 = vadd.f32 %v573_v21, %v1244_v20  ;;  %v1308_v8 = vadd.f32 %v1186_v34, %v552_v4 }
  0xf6   : > { %v575_v26 = vadd.f32 %v574_v24, %v1248_v23 }
  0xf8   : > { %v576_v29 = vadd.f32 %v575_v26, %v1252_v25 }
  0xfa   : > { %v577_v31 = vadd.f32 %v576_v29, %v1256_v28 }
  0xfc   : > { %v578_v35 = vadd.f32 %v577_v31, %v1260_v30 }
  0xfe   : > { %v579_v40 = vadd.f32 %v578_v35, %v1264_v33 }
 0x100   : > { %v580_v43 = vadd.f32 %v579_v40, %v1268_v37 }
 0x102   : > { %v581_v46 = vadd.f32 %v580_v43, %v1272_v41 }
 0x104   : > { %v582_v50 = vadd.f32 %v581_v46, %v1276_v44 }
 0x106   : > { %v583_v52 = vadd.f32 %v582_v50, %v1280_v48 }
 0x108   : > { %v584_v57 = vadd.f32 %v583_v52, %v1284_v51 }
 0x10a   : > { %v585_v59 = vadd.f32 %v584_v57, %v1288_v55 }
 0x10c   : > { %v586_v0 = vadd.f32 %v585_v59, %v1292_v58 }
 0x10e   : > { %v587_v2 = vadd.f32 %v586_v0, %v1296_v62 }
 0x110   : > { %v588_v7 = vadd.f32 %v587_v2, %v1300_v1 }
 0x112   : > { %v589_v9 = vadd.f32 %v588_v7, %v1304_v5 }
 0x114   : > { %v590_v12 = vadd.f32 %v589_v9, %v1308_v8 }
 0x116   : > { %v591_v14 = vadd.f32 %v590_v12, %v1312_v11 }
 0x118   : > { %v592_v15 = vrot.slane %v591_v14, 4 }
 0x11a   : > { %v593_v16 = vadd.f32 %v592_v15, %v591_v14 }
 0x11c   : > { %v594_v18 = vrot.slane %v593_v16, 2 }
 0x11e   : > { %v595_v19 = vadd.f32 %v594_v18, %v593_v16 }
 0x120   : > { %v596_v21 = vrot.slane %v595_v19, 1 }
 0x122   : > { %v597_v22 = vadd.f32 %v596_v21, %v595_v19 }
 0x124   : > { %v1316_v24 = vmul.f32 0.00390625, %v597_v22 }
 0x126   : > { %v1320_v26 = vsub.f32 %v1189_v36, %v1316_v24  ;;  %v1324_v34 = vsub.f32 %v1192_v38, %v1316_v24  ;;  %v1328_v27 = vsub.f32 %v1197_v42, %v1316_v24  ;;  %v1336_v32 = vsub.f32 %v1200_v45, %v1316_v24 }
 0x127   : > { %v1340_v36 = vsub.f32 %v1204_v49, %v1316_v24  ;;  %v1346_v42 = vsub.f32 %v1208_v53, %v1316_v24  ;;  %v1352_v45 = vsub.f32 %v1212_v56, %v1316_v24  ;;  %v1358_v46 = vsub.f32 %v1216_v60, %v1316_v24 }
 0x128   : > { %v632_v29 = vmul.f32 %v1320_v26, %v1320_v26  ;;  %v633_v31 = vmul.f32 %v1324_v34, %v1324_v34  ;;  %v634_v38 = vmul.f32 %v1328_v27, %v1328_v27  ;;  %v635_v40 = vmul.f32 %v1336_v32, %v1336_v32 }
 0x129   : > { %v636_v49 = vmul.f32 %v1340_v36, %v1340_v36  ;;  %v637_v53 = vmul.f32 %v1346_v42, %v1346_v42  ;;  %v1364_v50 = vsub.f32 %v1220_v63, %v1316_v24  ;;  %v638_v56 = vmul.f32 %v1352_v45, %v1352_v45 }
 0x12a   : > { %v664_v35 = vadd.f32 %v633_v31, %v632_v29  ;;  %v1370_v54 = vsub.f32 %v1224_v3, %v1316_v24  ;;  %v639_v60 = vmul.f32 %v1358_v46, %v1358_v46  ;;  %v1376_v59 = vsub.f32 %v1228_v6, %v1316_v24 }
 0x12b   : > { %v640_v63 = vmul.f32 %v1364_v50, %v1364_v50  ;;  %v1382_v0 = vsub.f32 %v1232_v10, %v1316_v24  ;;  %v1388_v4 = vsub.f32 %v1236_v13, %v1316_v24  ;;  %v1394_v9 = vsub.f32 %v1240_v17, %v1316_v24 }
 0x12c   : > { %v665_v39 = vadd.f32 %v664_v35, %v634_v38  ;;  %v641_v3 = vmul.f32 %v1370_v54, %v1370_v54  ;;  %v642_v6 = vmul.f32 %v1376_v59, %v1376_v59  ;;  %v1400_v14 = vsub.f32 %v1244_v20, %v1316_v24 }
 0x12d   : > { %v643_v10 = vmul.f32 %v1382_v0, %v1382_v0  ;;  %v644_v13 = vmul.f32 %v1388_v4, %v1388_v4  ;;  %v1406_v16 = vsub.f32 %v1248_v23, %v1316_v24  ;;  %v645_v17 = vmul.f32 %v1394_v9, %v1394_v9 }
 0x12e   : > { %v666_v43 = vadd.f32 %v665_v39, %v635_v40  ;;  %v1412_v19 = vsub.f32 %v1252_v25, %v1316_v24  ;;  %v646_v20 = vmul.f32 %v1400_v14, %v1400_v14  ;;  %v1418_v22 = vsub.f32 %v1256_v28, %v1316_v24 }
 0x12f   : > { %v647_v23 = vmul.f32 %v1406_v16, %v1406_v16  ;;  %v618_v31 = vsub.f32 %v1260_v30, %v1316_v24  ;;  %v619_v35 = vsub.f32 %v1264_v33, %v1316_v24  ;;  %v620_v28 = vsub.f32 %v1268_v37, %v1316_v24 }
 0x130   : > { %v667_v47 = vadd.f32 %v666_v43, %v636_v49  ;;  %v648_v38 = vmul.f32 %v1412_v19, %v1412_v19  ;;  %v649_v40 = vmul.f32 %v1418_v22, %v1418_v22  ;;  %v623_v33 = vsub.f32 %v1280_v48, %v1316_v24 }
 0x131   : > { %v650_v49 = vmul.f32 %v618_v31, %v618_v31  ;;  %v651_v30 = vmul.f32 %v619_v35, %v619_v35  ;;  %v624_v37 = vsub.f32 %v1284_v51, %v1316_v24  ;;  %v627_v48 = vsub.f32 %v1296_v62, %v1316_v24 }
 0x132   : > { %v668_v52 = vadd.f32 %v667_v47, %v637_v53  ;;  %v621_v53 = vsub.f32 %v1272_v41, %v1316_v24  ;;  %v625_v41 = vsub.f32 %v1288_v55, %v1316_v24  ;;  %v628_v51 = vsub.f32 %v1300_v1, %v1316_v24 }
 0x133   : > { %v629_v55 = vsub.f32 %v1304_v5, %v1316_v24  ;;  %v631_v62 = vsub.f32 %v1312_v11, %v1316_v24 }
 0x134   : > { %v669_v57 = vadd.f32 %v668_v52, %v638_v56  ;;  %v622_v56 = vsub.f32 %v1276_v44, %v1316_v24  ;;  %v652_v52 = vmul.f32 %v620_v28, %v620_v28  ;;  %v626_v44 = vsub.f32 %v1292_v58, %v1316_v24 }
 0x135   : > { %v630_v58 = vsub.f32 %v1308_v8, %v1316_v24  ;;  %v663_v1 = vmul.f32 %v631_v62, %v631_v62 }
 0x136   : > { %v670_v61 = vadd.f32 %v669_v57, %v639_v60  ;;  %v653_v57 = vmul.f32 %v621_v53, %v621_v53 }
 0x138   : > { %v671_v2 = vadd.f32 %v670_v61, %v640_v63  ;;  %v654_v61 = vmul.f32 %v622_v56, %v622_v56 }
 0x13a   : > { %v672_v7 = vadd.f32 %v671_v2, %v641_v3  ;;  %v655_v2 = vmul.f32 %v623_v33, %v623_v33 }
 0x13c   : > { %v673_v12 = vadd.f32 %v672_v7, %v642_v6  ;;  %v656_v7 = vmul.f32 %v624_v37, %v624_v37 }
 0x13e   : > { %v674_v15 = vadd.f32 %v673_v12, %v643_v10  ;;  %v657_v12 = vmul.f32 %v625_v41, %v625_v41 }
 0x140   : > { %v675_v18 = vadd.f32 %v674_v15, %v644_v13  ;;  %v658_v15 = vmul.f32 %v626_v44, %v626_v44 }
 0x142   : > { %v676_v21 = vadd.f32 %v675_v18, %v645_v17  ;;  %v659_v18 = vmul.f32 %v627_v48, %v627_v48 }
 0x144   : > { %v677_v29 = vadd.f32 %v676_v21, %v646_v20  ;;  %v660_v21 = vmul.f32 %v628_v51, %v628_v51 }
 0x146   : > { %v678_v25 = vadd.f32 %v677_v29, %v647_v23  ;;  %v661_v29 = vmul.f32 %v629_v55, %v629_v55 }
 0x148   : > { %v679_v39 = vadd.f32 %v678_v25, %v648_v38  ;;  %v662_v25 = vmul.f32 %v630_v58, %v630_v58 }
 0x14a   : > { %v680_v43 = vadd.f32 %v679_v39, %v649_v40 }
 0x14c   : > { %v681_v47 = vadd.f32 %v680_v43, %v650_v49 }
 0x14e   : > { %v682_v60 = vadd.f32 %v681_v47, %v651_v30 }
 0x150   : > { %v683_v63 = vadd.f32 %v682_v60, %v652_v52 }
 0x152   : > { %v684_v3 = vadd.f32 %v683_v63, %v653_v57 }
 0x154   : > { %v685_v6 = vadd.f32 %v684_v3, %v654_v61 }
 0x156   : > { %v686_v10 = vadd.f32 %v685_v6, %v655_v2 }
 0x158   : > { %v687_v13 = vadd.f32 %v686_v10, %v656_v7 }
 0x15a   : > { %v688_v17 = vadd.f32 %v687_v13, %v657_v12 }
 0x15c   : > { %v689_v20 = vadd.f32 %v688_v17, %v658_v15 }
 0x15e   : > { %v690_v23 = vadd.f32 %v689_v20, %v659_v18 }
 0x160   : > { %v691_v38 = vadd.f32 %v690_v23, %v660_v21 }
 0x162   : > { %v692_v40 = vadd.f32 %v691_v38, %v661_v29 }
 0x164   : > { %v693_v39 = vadd.f32 %v692_v40, %v662_v25 }
 0x166   : > { %v694_v49 = vadd.f32 %v693_v39, %v663_v1 }
 0x168   : > { %v695_v43 = vrot.slane %v694_v49, 4 }
 0x16a   : > { %v696_v30 = vadd.f32 %v695_v43, %v694_v49 }
 0x16c   : > { %v697_v5 = vrot.slane %v696_v30, 2 }
 0x16e   : > { %v698_v47 = vadd.f32 %v697_v5, %v696_v30 }
 0x170   : > { %v699_v52 = vrot.slane %v698_v47, 1 }
 0x172   : > { %v700_v60 = vadd.f32 %v699_v52, %v698_v47 }
 0x174   : > { %v701_v57 = vmul.f32 0.00390625, %v700_v60 }
 0x176   : > { %v702_v8 = vadd.f32 1e-05, %v701_v57 }
 0x178   : > { %1060 = vrsqrt.f32 %v702_v8 }
 0x185   : > { %v1061_v63 = vpop.eup %1060 }
 0x186   : > { %v1454_v61 = vmul.f32 %v1061_v63, %v618_v31  ;;  %v1456_v11 = vmul.f32 %v1061_v63, %v619_v35  ;;  %v1458_v24 = vmul.f32 %v1061_v63, %v620_v28  ;;  %v1460_v3 = vmul.f32 %v1061_v63, %v621_v53 }
 0x187   : > { %v1462_v2 = vmul.f32 %v1061_v63, %v622_v56  ;;  %v1464_v6 = vmul.f32 %v1061_v63, %v623_v33  ;;  %v1466_v7 = vmul.f32 %v1061_v63, %v624_v37  ;;  %v1468_v10 = vmul.f32 %v1061_v63, %v625_v41 }
 0x188   : > { %v1470_v12 = vmul.f32 %v1061_v63, %v626_v44  ;;  %v1472_v13 = vmul.f32 %v1061_v63, %v627_v48  ;;  %v1474_v31 = vmul.f32 %v1061_v63, %v628_v51  ;;  %v1476_v35 = vmul.f32 %v1061_v63, %v629_v55 }
 0x189   : > { %1787 = vst [vmem:[#allocation3_spill] sm:$0xff] %v1468_v10  ;;  %v1478_v28 = vmul.f32 %v1061_v63, %v630_v58  ;;  %v1480_v53 = vmul.f32 %v1061_v63, %v631_v62  ;;  %v1483_v56 = vmul.f32 %v1061_v63, %v1320_v26  ;;  %v1486_v33 = vmul.f32 %v1061_v63, %v1324_v34 }
 0x18a   : > { %1788 = vst [vmem:[#allocation4_spill] sm:$0xff] %v1470_v12  ;;  %1789 = vst [vmem:[#allocation5_spill] sm:$0xff] %v1472_v13  ;;  %v1488_v37 = vstv %s736_s26  ;;  %v1491_v41 = vmul.f32 %v1061_v63, %v1328_v27  ;;  %v1494_v44 = vmul.f32 %v1061_v63, %v1336_v32  ;;  %v1497_v48 = vmul.f32 %v1061_v63, %v1340_v36 }
 0x18b   : > { %1790 = vst [vmem:[#allocation6_spill] sm:$0xff] %v1476_v35  ;;  %1791 = vst [vmem:[#allocation7_spill] sm:$0xff] %v1478_v28  ;;  %v1500_v51 = vmul.f32 %v1061_v63, %v1346_v42  ;;  %v1503_v26 = vmul.f32 %v1061_v63, %v1352_v45  ;;  %v1506_v34 = vmul.f32 %v1061_v63, %v1358_v46  ;;  %vm737_vm1 = vcmp.ge.f32.partialorder %v1483_v56, 0.0 }
 0x18c   : > { %v1509_v15 = vmul.f32 %v1061_v63, %v1364_v50  ;;  %v1512_v27 = vmul.f32 %v1061_v63, %v1370_v54  ;;  %v1515_v32 = vmul.f32 %v1061_v63, %v1376_v59  ;;  %v1518_v36 = vmul.f32 %v1061_v63, %v1382_v0 }
 0x18d   : > { %v1521_v42 = vmul.f32 %v1061_v63, %v1388_v4  ;;  %v1524_v45 = vmul.f32 %v1061_v63, %v1394_v9  ;;  %v1527_v46 = vmul.f32 %v1061_v63, %v1400_v14  ;;  %v1530_v50 = vmul.f32 %v1061_v63, %v1406_v16 }
 0x18e   : > { %v1533_v54 = vmul.f32 %v1061_v63, %v1412_v19  ;;  %v1536_v59 = vmul.f32 %v1061_v63, %v1418_v22  ;;  %vm738_vm2 = vcmp.ge.f32.partialorder %v1486_v33, 0.0  ;;  %vm739_vm3 = vcmp.ge.f32.partialorder %v1491_v41, 0.0 }
 0x18f   : > { %vm740_vm4 = vcmp.ge.f32.partialorder %v1494_v44, 0.0  ;;  %vm741_vm5 = vcmp.ge.f32.partialorder %v1497_v48, 0.0  ;;  %vm742_vm6 = vcmp.ge.f32.partialorder %v1500_v51, 0.0  ;;  %vm743_vm7 = vcmp.ge.f32.partialorder %v1503_v26, 0.0 }
 0x190   : > { %vm744_vm8 = vcmp.ge.f32.partialorder %v1506_v34, 0.0  ;;  %vm745_vm9 = vcmp.ge.f32.partialorder %v1509_v15, 0.0  ;;  %vm746_vm10 = vcmp.ge.f32.partialorder %v1512_v27, 0.0  ;;  %vm747_vm11 = vcmp.ge.f32.partialorder %v1515_v32, 0.0 }
 0x191   : > { %vm748_vm12 = vcmp.ge.f32.partialorder %v1518_v36, 0.0  ;;  %v770_v0 = vmul.f32 %v1488_v37, %v1483_v56  ;;  %v771_v4 = vmul.f32 %v1488_v37, %v1486_v33  ;;  %v772_v9 = vmul.f32 %v1488_v37, %v1491_v41 }
 0x192   : > { %v773_v14 = vmul.f32 %v1488_v37, %v1494_v44  ;;  %v774_v16 = vmul.f32 %v1488_v37, %v1497_v48  ;;  %v775_v19 = vmul.f32 %v1488_v37, %v1500_v51  ;;  %v776_v22 = vmul.f32 %v1488_v37, %v1503_v26 }
 0x193   : > { %v777_v17 = vmul.f32 %v1488_v37, %v1506_v34  ;;  %v778_v55 = vmul.f32 %v1488_v37, %v1509_v15  ;;  %v779_v18 = vmul.f32 %v1488_v37, %v1512_v27  ;;  %v780_v20 = vmul.f32 %v1488_v37, %v1515_v32 }
 0x194   : > { %v781_v58 = vmul.f32 %v1488_v37, %v1518_v36  ;;  %v782_v21 = vmul.f32 %v1488_v37, %v1521_v42  ;;  %v783_v23 = vmul.f32 %v1488_v37, %v1524_v45  ;;  %v784_v62 = vmul.f32 %v1488_v37, %v1527_v46 }
 0x195   : > { %v785_v29 = vmul.f32 %v1488_v37, %v1530_v50  ;;  %vm765_vm13 = vcmp.ge.f32.partialorder %v1474_v31, 0.0  ;;  %vm766_vm14 = vcmp.ge.f32.partialorder %v1476_v35, 0.0  ;;  %vm767_vm15 = vcmp.ge.f32.partialorder %v1478_v28, 0.0 }
 0x196   : > { %vm768_vm0 = vcmp.ge.f32.partialorder %v1480_v53, 0.0  ;;  %v786_v38 = vmul.f32 %v1488_v37, %v1533_v54  ;;  %v787_v25 = vmul.f32 %v1488_v37, %v1536_v59  ;;  %v788_v40 = vmul.f32 %v1488_v37, %v1454_v61 }
 0x197   : > { %v789_v1 = vmul.f32 %v1488_v37, %v1456_v11  ;;  %v790_v39 = vmul.f32 %v1488_v37, %v1458_v24  ;;  %v791_v49 = vmul.f32 %v1488_v37, %v1460_v3  ;;  %v792_v43 = vmul.f32 %v1488_v37, %v1462_v2 }
 0x198   : > { %v793_v30 = vmul.f32 %v1488_v37, %v1464_v6  ;;  %v794_v5 = vmul.f32 %v1488_v37, %v1466_v7  ;;  %v795_v47 = vmul.f32 %v1488_v37, %v1468_v10  ;;  %v796_v52 = vmul.f32 %v1488_v37, %v1470_v12 }
 0x199   : > { %v797_v60 = vmul.f32 %v1488_v37, %v1472_v13  ;;  %v798_v57 = vmul.f32 %v1488_v37, %v1474_v31  ;;  %v799_v8 = vmul.f32 %v1488_v37, %v1476_v35  ;;  %v800_v63 = vmul.f32 %v1488_v37, %v1478_v28 }
 0x19a   : > { %v801_v10 = vmul.f32 %v1488_v37, %v1480_v53  ;;  %v802_v12 = vsel %vm737_vm1, %v1483_v56, %v770_v0  ;;  %v803_v13 = vsel %vm738_vm2, %v1486_v33, %v771_v4  ;;  %v804_v35 = vsel %vm739_vm3, %v1491_v41, %v772_v9  ;;  %v1812_v0 = vld [vmem:[#allocation7_spill] sm:$0xff] }
 0x19b   : > { %v805_v28 = vsel %vm740_vm4, %v1494_v44, %v773_v14  ;;  %v806_v56 = vsel %vm741_vm5, %v1497_v48, %v774_v16  ;;  %v807_v37 = vsel %vm742_vm6, %v1500_v51, %v775_v19  ;;  %v808_v33 = vsel %vm743_vm7, %v1503_v26, %v776_v22  ;;  %834 = vst [vmem:[%s1623_s29] sm:$0xff] %v802_v12 }
 0x19c   : > { %v809_v41 = vsel %vm744_vm8, %v1506_v34, %v777_v17  ;;  %835 = vst [vmem:[%s1623_s29 + $0x8] sm:$0xff] %v803_v13  ;;  %836 = vst [vmem:[%s1623_s29 + $0x10] sm:$0xff] %v804_v35  ;;  %v810_v44 = vsel %vm745_vm9, %v1509_v15, %v778_v55  ;;  %v811_v48 = vsel %vm746_vm10, %v1512_v27, %v779_v18  ;;  %vm1792_vm1 = vcmp.ge.f32.partialorder %v1521_v42, 0.0 }
 0x19d   : > { %837 = vst [vmem:[%s1623_s29 + $0x18] sm:$0xff] %v805_v28  ;;  %v812_v51 = vsel %vm747_vm11, %v1515_v32, %v780_v20  ;;  %v813_v12 = vsel %vm748_vm12, %v1518_v36, %v781_v58  ;;  %838 = vst [vmem:[%s1623_s29 + $0x20] sm:$0xff] %v806_v56  ;;  %v814_v13 = vsel %vm1792_vm1, %v1521_v42, %v782_v21  ;;  %vm1793_vm2 = vcmp.ge.f32.partialorder %v1524_v45, 0.0 }
 0x19e   : > { %839 = vst [vmem:[%s1623_s29 + $0x28] sm:$0xff] %v807_v37  ;;  %840 = vst [vmem:[%s1623_s29 + $0x30] sm:$0xff] %v808_v33  ;;  %v815_v35 = vsel %vm1793_vm2, %v1524_v45, %v783_v23  ;;  %vm1794_vm3 = vcmp.ge.f32.partialorder %v1527_v46, 0.0  ;;  %vm1795_vm4 = vcmp.ge.f32.partialorder %v1530_v50, 0.0  ;;  %vm1796_vm5 = vcmp.ge.f32.partialorder %v1533_v54, 0.0  ;;  %v1807_v45 = vld [vmem:[#allocation4_spill] sm:$0xff] }
 0x19f   : > { %841 = vst [vmem:[%s1623_s29 + $0x38] sm:$0xff] %v809_v41  ;;  %v816_v28 = vsel %vm1794_vm3, %v1527_v46, %v784_v62  ;;  %v817_v26 = vsel %vm1795_vm4, %v1530_v50, %v785_v29  ;;  %842 = vst [vmem:[%s1623_s29 + $0x40] sm:$0xff] %v810_v44  ;;  %v818_v34 = vsel %vm1796_vm5, %v1533_v54, %v786_v38  ;;  %vm1797_vm6 = vcmp.ge.f32.partialorder %v1536_v59, 0.0  ;;  %v1809_v46 = vld [vmem:[#allocation5_spill] sm:$0xff]  ;;  %v1811_v54 = vld [vmem:[#allocation6_spill] sm:$0xff] }
 0x1a0   : > { %843 = vst [vmem:[%s1623_s29 + $0x48] sm:$0xff] %v811_v48  ;;  %844 = vst [vmem:[%s1623_s29 + $0x50] sm:$0xff] %v812_v51  ;;  %v819_v15 = vsel %vm1797_vm6, %v1536_v59, %v787_v25  ;;  %vm1798_vm7 = vcmp.ge.f32.partialorder %v1454_v61, 0.0  ;;  %vm1799_vm8 = vcmp.ge.f32.partialorder %v1456_v11, 0.0  ;;  %vm1800_vm9 = vcmp.ge.f32.partialorder %v1458_v24, 0.0 }
 0x1a1   : > { %845 = vst [vmem:[%s1623_s29 + $0x58] sm:$0xff] %v813_v12  ;;  %v820_v27 = vsel %vm1798_vm7, %v1454_v61, %v788_v40  ;;  %v821_v32 = vsel %vm1799_vm8, %v1456_v11, %v789_v1  ;;  %846 = vst [vmem:[%s1623_s29 + $0x60] sm:$0xff] %v814_v13  ;;  %v822_v36 = vsel %vm1800_vm9, %v1458_v24, %v790_v39  ;;  %vm1801_vm10 = vcmp.ge.f32.partialorder %v1460_v3, 0.0 }
 0x1a2   : > { %847 = vst [vmem:[%s1623_s29 + $0x68] sm:$0xff] %v815_v35  ;;  %848 = vst [vmem:[%s1623_s29 + $0x70] sm:$0xff] %v816_v28  ;;  %v823_v61 = vsel %vm1801_vm10, %v1460_v3, %v791_v49  ;;  %vm1802_vm11 = vcmp.ge.f32.partialorder %v1462_v2, 0.0  ;;  %vm1803_vm12 = vcmp.ge.f32.partialorder %v1464_v6, 0.0  ;;  %vm1804_vm1 = vcmp.ge.f32.partialorder %v1466_v7, 0.0  ;;  %v1805_v3 = vld [vmem:[#allocation3_spill] sm:$0xff] }
 0x1a3   : > { %849 = vst [vmem:[%s1623_s29 + $0x78] sm:$0xff] %v817_v26  ;;  %v824_v11 = vsel %vm1802_vm11, %v1462_v2, %v792_v43  ;;  %v825_v42 = vsel %vm1803_vm12, %v1464_v6, %v793_v30  ;;  %850 = vst [vmem:[%s1623_s29 + $0x80] sm:$0xff] %v818_v34  ;;  %v826_v24 = vsel %vm1804_vm1, %v1466_v7, %v794_v5  ;;  %vm1806_vm2 = vcmp.ge.f32.partialorder %v1805_v3, 0.0 }
 0x1a4   : > { %851 = vst [vmem:[%s1623_s29 + $0x88] sm:$0xff] %v819_v15  ;;  %852 = vst [vmem:[%s1623_s29 + $0x90] sm:$0xff] %v820_v27  ;;  %v827_v2 = vsel %vm1806_vm2, %v1805_v3, %v795_v47  ;;  %vm1808_vm3 = vcmp.ge.f32.partialorder %v1807_v45, 0.0  ;;  %vm1810_vm4 = vcmp.ge.f32.partialorder %v1809_v46, 0.0  ;;  %v830_v7 = vsel %vm765_vm13, %v1474_v31, %v798_v57 }
 0x1a5   : > { %853 = vst [vmem:[%s1623_s29 + $0x98] sm:$0xff] %v821_v32  ;;  %v828_v6 = vsel %vm1808_vm3, %v1807_v45, %v796_v52  ;;  %v829_v50 = vsel %vm1810_vm4, %v1809_v46, %v797_v60  ;;  %854 = vst [vmem:[%s1623_s29 + $0xa0] sm:$0xff] %v822_v36  ;;  %v831_v59 = vsel %vm766_vm14, %v1811_v54, %v799_v8 }
 0x1a6   : > { %855 = vst [vmem:[%s1623_s29 + $0xa8] sm:$0xff] %v823_v61  ;;  %856 = vst [vmem:[%s1623_s29 + $0xb0] sm:$0xff] %v824_v11  ;;  %v832_v4 = vsel %vm767_vm15, %v1812_v0, %v800_v63  ;;  %v833_v9 = vsel %vm768_vm0, %v1480_v53, %v801_v10 }
 0x1a7   : > { %857 = vst [vmem:[%s1623_s29 + $0xb8] sm:$0xff] %v825_v42  ;;  %858 = vst [vmem:[%s1623_s29 + $0xc0] sm:$0xff] %v826_v24 }
 0x1a8   : > { %859 = vst [vmem:[%s1623_s29 + $0xc8] sm:$0xff] %v827_v2  ;;  %860 = vst [vmem:[%s1623_s29 + $0xd0] sm:$0xff] %v828_v6 }
 0x1a9   : > { %861 = vst [vmem:[%s1623_s29 + $0xd8] sm:$0xff] %v829_v50  ;;  %862 = vst [vmem:[%s1623_s29 + $0xe0] sm:$0xff] %v830_v7 }
 0x1aa   : > { %863 = vst [vmem:[%s1623_s29 + $0xe8] sm:$0xff] %v831_v59  ;;  %864 = vst [vmem:[%s1623_s29 + $0xf0] sm:$0xff] %v832_v4 }
 0x1ab   : > { %865 = vst [vmem:[%s1623_s29 + $0xf8] sm:$0xff] %v833_v9 }
 0x1ac PF: > { %s15_s17 = sadd.s32 1, %s1068_s17  }
 0x1ad   : > { %p12_p4 = scmp.ge.s32.totalorder %s15_s17, 4  }
 0x1af   :  { %14 = sbr.rel (!%p12_p4) target bundleno = 2 (0x2), region = 66 }

// kernel: d_down_block.5
= control target key start
LH: loop header
LB: loop body
LE: loop exit
PB: predicated region body
PF: predicated region fallthrough
CT: control target
= control target key end

     0   :  { %s654_s17 = smov 0   ;;  %s890_s0 = inlined_call_operand.vmem [shape: f32[2,16,512], index: 0, kind: input, shape index: {}]   ;;  %s891_s1 = inlined_call_operand.vmem [shape: f32[512,128], index: 1, kind: input, shape index: {}]   ;;  %s892_s2 = inlined_call_operand.vmem [shape: f32[1,128], index: 2, kind: input, shape index: {}]   ;;  %s893_s3 = inlined_call_operand.<no memory space> [shape: f32[1,1], index: 3, kind: input, shape index: {}]   ;;  %s894_s4 = inlined_call_operand.vmem [shape: f32[2,16,128], index: 4, kind: output, shape index: {}]  }
   0x1   :  { %9 = sst [smem:[#allocation2]] %s893_s3 }
   0x2 LB: > { %s518_s18 = sadd.s32 4294967295, %s624_s17   ;;  %p522_p0 = scmp.ge.s32.totalorder %s624_s17, 1  ;;  %s624_s17 = sphi %s654_s17, %s15_s17  }
   0x3   : > { %p163_p1 = scmp.lt.s32.totalorder %s624_s17, 3 }
   0x5   : > { %p164_p2 = pnand %p522_p0, %p163_p1 }
   0x6   : > { %p772_p3 = scmp.lt.s32.totalorder (!%p164_p2), %s518_s18, 1  ;;  %s453_s28 = sld [smem:[#allocation2]] (!%p164_p2) }
   0x7   : > { %167 = sbr.rel (%p164_p2) target bundleno = 310 (0x136), region = 36 }
   0xc   : > { %v238_v0 = vld [vmem:[%s891_s1 + $0xf8] sm:$0xff]  ;;  %v237_v4 = vld [vmem:[%s891_s1 + $0xf0] sm:$0xff]  ;;  %v236_v8 = vld [vmem:[%s891_s1 + $0xe8] sm:$0xff]  ;;  %s897_s18 = smov (!%p772_p3, %s518_s18), 1 }
   0xd   : > { %v270_v1 = vld [vmem:[%s891_s1 + $0x1f8] sm:$0xff]  ;;  %532 = vmatprep.subr.mxu0 %v238_v0  ;;  %v269_v5 = vld [vmem:[%s891_s1 + $0x1f0] sm:$0xff]  ;;  %v268_v9 = vld [vmem:[%s891_s1 + $0x1e8] sm:$0xff]  ;;  %s530_s23 = sshll.u32 %s897_s18, 6  ;;  %s531_s29 = sshll.u32 %s897_s18, 4 }
   0xe   : > { %v222_v2 = vld [vmem:[%s891_s1 + $0x78] sm:$0xff]  ;;  %570 = vmatprep.subr.mxu1 %v270_v1  ;;  %v221_v6 = vld [vmem:[%s891_s1 + $0x70] sm:$0xff]  ;;  %v220_v10 = vld [vmem:[%s891_s1 + $0x68] sm:$0xff]  ;;  %s852_s12 = scalar_lea.vmem %s890_s0, %s530_s23  ;;  %s198_s6 = scalar_lea.vmem %s894_s4, %s531_s29 }
   0xf   : > { %v254_v3 = vld [vmem:[%s891_s1 + $0x178] sm:$0xff]  ;;  %533 = vmatpush3.msra.mxu0 %v222_v2  ;;  %v253_v7 = vld [vmem:[%s891_s1 + $0x170] sm:$0xff]  ;;  %v252_v11 = vld [vmem:[%s891_s1 + $0x168] sm:$0xff] }
  0x10   : > { %571 = vmatpush3.msra.mxu1 %v254_v3  ;;  %534 = vmatprep.subr.mxu0 %v237_v4  ;;  %v235_v12 = vld [vmem:[%s891_s1 + $0xe0] sm:$0xff]  ;;  %v234_v16 = vld [vmem:[%s891_s1 + $0xd8] sm:$0xff]  ;;  %v233_v20 = vld [vmem:[%s891_s1 + $0xd0] sm:$0xff] }
  0x11   : > { %572 = vmatprep.subr.mxu1 %v269_v5  ;;  %535 = vmatpush3.msra.mxu0 %v221_v6  ;;  %v267_v13 = vld [vmem:[%s891_s1 + $0x1e0] sm:$0xff]  ;;  %v266_v17 = vld [vmem:[%s891_s1 + $0x1d8] sm:$0xff]  ;;  %v265_v21 = vld [vmem:[%s891_s1 + $0x1d0] sm:$0xff] }
  0x12   : > { %573 = vmatpush3.msra.mxu1 %v253_v7  ;;  %536 = vmatprep.subr.mxu0 %v236_v8  ;;  %v219_v14 = vld [vmem:[%s891_s1 + $0x60] sm:$0xff]  ;;  %v218_v18 = vld [vmem:[%s891_s1 + $0x58] sm:$0xff]  ;;  %v217_v22 = vld [vmem:[%s891_s1 + $0x50] sm:$0xff] }
  0x13   : > { %574 = vmatprep.subr.mxu1 %v268_v9  ;;  %v251_v15 = vld [vmem:[%s891_s1 + $0x160] sm:$0xff]  ;;  %537 = vmatpush3.msra.mxu0 %v220_v10  ;;  %v250_v19 = vld [vmem:[%s891_s1 + $0x158] sm:$0xff]  ;;  %v249_v23 = vld [vmem:[%s891_s1 + $0x150] sm:$0xff] }
  0x14   : > { %575 = vmatpush3.msra.mxu1 %v252_v11  ;;  %538 = vmatprep.subr.mxu0 %v235_v12  ;;  %v232_v24 = vld [vmem:[%s891_s1 + $0xc8] sm:$0xff]  ;;  %v231_v28 = vld [vmem:[%s891_s1 + $0xc0] sm:$0xff]  ;;  %v230_v32 = vld [vmem:[%s891_s1 + $0xb8] sm:$0xff] }
  0x15   : > { %576 = vmatprep.subr.mxu1 %v267_v13  ;;  %539 = vmatpush3.msra.mxu0 %v219_v14  ;;  %v264_v25 = vld [vmem:[%s891_s1 + $0x1c8] sm:$0xff]  ;;  %v263_v29 = vld [vmem:[%s891_s1 + $0x1c0] sm:$0xff]  ;;  %v262_v33 = vld [vmem:[%s891_s1 + $0x1b8] sm:$0xff] }
  0x16   : > { %577 = vmatpush3.msra.mxu1 %v251_v15  ;;  %540 = vmatprep.subr.mxu0 %v234_v16  ;;  %v216_v26 = vld [vmem:[%s891_s1 + $0x48] sm:$0xff]  ;;  %v215_v30 = vld [vmem:[%s891_s1 + $0x40] sm:$0xff]  ;;  %v214_v34 = vld [vmem:[%s891_s1 + $0x38] sm:$0xff] }
  0x17   : > { %578 = vmatprep.subr.mxu1 %v266_v17  ;;  %541 = vmatpush3.msra.mxu0 %v218_v18  ;;  %v248_v27 = vld [vmem:[%s891_s1 + $0x148] sm:$0xff]  ;;  %v247_v31 = vld [vmem:[%s891_s1 + $0x140] sm:$0xff]  ;;  %v246_v35 = vld [vmem:[%s891_s1 + $0x138] sm:$0xff] }
  0x18   : > { %579 = vmatpush3.msra.mxu1 %v250_v19  ;;  %542 = vmatprep.subr.mxu0 %v233_v20  ;;  %v229_v36 = vld [vmem:[%s891_s1 + $0xb0] sm:$0xff]  ;;  %v228_v40 = vld [vmem:[%s891_s1 + $0xa8] sm:$0xff]  ;;  %v227_v44 = vld [vmem:[%s891_s1 + $0xa0] sm:$0xff] }
  0x19   : > { %580 = vmatprep.subr.mxu1 %v265_v21  ;;  %543 = vmatpush3.msra.mxu0 %v217_v22  ;;  %v261_v37 = vld [vmem:[%s891_s1 + $0x1b0] sm:$0xff]  ;;  %v260_v41 = vld [vmem:[%s891_s1 + $0x1a8] sm:$0xff]  ;;  %v259_v45 = vld [vmem:[%s891_s1 + $0x1a0] sm:$0xff] }
  0x1a   : > { %581 = vmatpush3.msra.mxu1 %v249_v23  ;;  %544 = vmatprep.subr.mxu0 %v232_v24  ;;  %v213_v38 = vld [vmem:[%s891_s1 + $0x30] sm:$0xff]  ;;  %v212_v42 = vld [vmem:[%s891_s1 + $0x28] sm:$0xff]  ;;  %v211_v46 = vld [vmem:[%s891_s1 + $0x20] sm:$0xff] }
  0x1b   : > { %582 = vmatprep.subr.mxu1 %v264_v25  ;;  %545 = vmatpush3.msra.mxu0 %v216_v26  ;;  %v245_v39 = vld [vmem:[%s891_s1 + $0x130] sm:$0xff]  ;;  %v244_v43 = vld [vmem:[%s891_s1 + $0x128] sm:$0xff]  ;;  %v243_v47 = vld [vmem:[%s891_s1 + $0x120] sm:$0xff] }
  0x1c   : > { %583 = vmatpush3.msra.mxu1 %v248_v27  ;;  %546 = vmatprep.subr.mxu0 %v231_v28  ;;  %v226_v48 = vld [vmem:[%s891_s1 + $0x98] sm:$0xff]  ;;  %v225_v52 = vld [vmem:[%s891_s1 + $0x90] sm:$0xff]  ;;  %v224_v56 = vld [vmem:[%s891_s1 + $0x88] sm:$0xff] }
  0x1d   : > { %584 = vmatprep.subr.mxu1 %v263_v29  ;;  %547 = vmatpush3.msra.mxu0 %v215_v30  ;;  %v258_v49 = vld [vmem:[%s891_s1 + $0x198] sm:$0xff]  ;;  %v257_v53 = vld [vmem:[%s891_s1 + $0x190] sm:$0xff]  ;;  %v256_v57 = vld [vmem:[%s891_s1 + $0x188] sm:$0xff] }
  0x1e   : > { %585 = vmatpush3.msra.mxu1 %v247_v31  ;;  %548 = vmatprep.subr.mxu0 %v230_v32  ;;  %v210_v50 = vld [vmem:[%s891_s1 + $0x18] sm:$0xff]  ;;  %v209_v54 = vld [vmem:[%s891_s1 + $0x10] sm:$0xff]  ;;  %v208_v58 = vld [vmem:[%s891_s1 + $0x8] sm:$0xff] }
  0x1f   : > { %586 = vmatprep.subr.mxu1 %v262_v33  ;;  %549 = vmatpush3.msra.mxu0 %v214_v34  ;;  %v242_v51 = vld [vmem:[%s891_s1 + $0x118] sm:$0xff]  ;;  %v241_v55 = vld [vmem:[%s891_s1 + $0x110] sm:$0xff]  ;;  %v240_v59 = vld [vmem:[%s891_s1 + $0x108] sm:$0xff] }
  0x20   : > { %587 = vmatpush3.msra.mxu1 %v246_v35  ;;  %550 = vmatprep.subr.mxu0 %v229_v36  ;;  %v223_v60 = vld [vmem:[%s891_s1 + $0x80] sm:$0xff]  ;;  %v200_v63 = vld [vmem:[%s852_s12 + $0x8] sm:$0xff]  ;;  %v202_v1 = vld [vmem:[%s852_s12 + $0x18] sm:$0xff] }
  0x21   : > { %588 = vmatprep.subr.mxu1 %v261_v37  ;;  %551 = vmatpush3.msra.mxu0 %v213_v38  ;;  %v255_v61 = vld [vmem:[%s891_s1 + $0x180] sm:$0xff]  ;;  %v201_v3 = vld [vmem:[%s852_s12 + $0x10] sm:$0xff]  ;;  %v204_v4 = vld [vmem:[%s852_s12 + $0x28] sm:$0xff] }
  0x22   : > { %589 = vmatpush3.msra.mxu1 %v245_v39  ;;  %552 = vmatprep.subr.mxu0 %v228_v40  ;;  %v207_v62 = vld [vmem:[%s891_s1] sm:$0xff]  ;;  %v206_v5 = vld [vmem:[%s852_s12 + $0x38] sm:$0xff]  ;;  %v205_v7 = vld [vmem:[%s852_s12 + $0x30] sm:$0xff] }
  0x23   : > { %590 = vmatprep.subr.mxu1 %v260_v41  ;;  %553 = vmatpush3.msra.mxu0 %v212_v42  ;;  %v239_v0 = vld [vmem:[%s891_s1 + $0x100] sm:$0xff] }
  0x24   : > { %591 = vmatpush3.msra.mxu1 %v244_v43  ;;  %554 = vmatprep.subr.mxu0 %v227_v44  ;;  %v199_v2 = vld [vmem:[%s852_s12] sm:$0xff] }
  0x25   : > { %592 = vmatprep.subr.mxu1 %v259_v45  ;;  %555 = vmatpush3.msra.mxu0 %v211_v46  ;;  %v203_v6 = vld [vmem:[%s852_s12 + $0x20] sm:$0xff] }
  0x26   : > { %593 = vmatpush3.msra.mxu1 %v243_v47  ;;  %556 = vmatprep.subr.mxu0 %v226_v48  ;;  %v527_v13 = vld [vmem:[%s892_s2] ss:$0 sm:$0xff]  ;;  %v456_v47 = vstv %s453_s28 }
  0x27   : > { %594 = vmatprep.subr.mxu1 %v258_v49  ;;  %557 = vmatpush3.msra.mxu0 %v210_v50 }
  0x28   : > { %595 = vmatpush3.msra.mxu1 %v242_v51  ;;  %558 = vmatprep.subr.mxu0 %v225_v52 }
  0x29   : > { %596 = vmatprep.subr.mxu1 %v257_v53  ;;  %559 = vmatpush3.msra.mxu0 %v209_v54 }
  0x2a   : > { %597 = vmatpush3.msra.mxu1 %v241_v55  ;;  %560 = vmatprep.subr.mxu0 %v224_v56 }
  0x2b   : > { %598 = vmatprep.subr.mxu1 %v256_v57  ;;  %561 = vmatpush3.msra.mxu0 %v208_v58 }
  0x2c   : > { %599 = vmatpush3.msra.mxu1 %v240_v59  ;;  %562 = vmatprep.subr.mxu0 %v223_v60 }
  0x2d   : > { %600 = vmatprep.subr.mxu1 %v255_v61  ;;  %563 = vmatpush3.msra.mxu0 %v207_v62 }
  0x2e   : > { %342 = vmatprep.mubr.f32.mxu0 %v200_v63  ;;  %601 = vmatpush3.msra.mxu1 %v239_v0 }
  0x2f   : > { %417 = vmatprep.mubr.f32.mxu1 %v202_v1  ;;  %343 = vmatmul.mubr.f32.vlgmr.msra.gmra.mxu0 %v199_v2 }
  0x30   : > { %418 = vmatmul.mubr.f32.vlgmr.msra.gmra.mxu1 %v201_v3  ;;  %347 = vmatprep.mubr.f32.mxu0 %v204_v4 }
  0x31   : > { %422 = vmatprep.mubr.f32.mxu1 %v206_v5 }
  0x33   : > { %348 = vmatmul.mubr.f32.gmra.mxu0 %v203_v6 }
  0x34   : > { %423 = vmatmul.mubr.f32.gmra.mxu1 %v205_v7 }
  0xef   : > { %v564_v8 = vpop.f32.mrf.mxu0 }
  0xf0   : > { %v602_v9 = vpop.f32.mrf.mxu1 }
  0xf1   : > { %v565_v10 = vpop.f32.mrf.mxu0 }
  0xf2   : > { %v603_v11 = vpop.f32.mrf.mxu1  ;;  %v566_v12 = vadd.f32 %v565_v10, %v564_v8 }
  0xf3   : > { %v567_v14 = vpop.f32.mrf.mxu0  ;;  %v604_v20 = vadd.f32 %v603_v11, %v602_v9 }
  0xf4   : > { %v605_v15 = vpop.f32.mrf.mxu1  ;;  %v345_v18 = vadd.f32 %v566_v12, %v527_v13 }
  0xf5   : > { %v568_v16 = vpop.f32.mrf.mxu0 }
  0xf6   : > { %v606_v17 = vpop.f32.mrf.mxu1  ;;  %v569_v19 = vadd.f32 %v568_v16, %v567_v14  ;;  %v420_v23 = vadd.f32 %v604_v20, %v345_v18 }
  0xf7   : > { %v607_v22 = vadd.f32 %v606_v17, %v605_v15 }
  0xf8   : > { %v350_v21 = vadd.f32 %v569_v19, %v527_v13 }
  0xfa   : > { %v425_v24 = vadd.f32 %v607_v22, %v350_v21 }
  0xfc   : > { %v428_v25 = vadd.f32 %v425_v24, %v420_v23 }
  0xfe   : > { %v429_v26 = vrot.slane %v428_v25, 4 }
 0x100   : > { %v430_v27 = vadd.f32 %v429_v26, %v428_v25 }
 0x102   : > { %v431_v28 = vrot.slane %v430_v27, 2 }
 0x104   : > { %v432_v29 = vadd.f32 %v431_v28, %v430_v27 }
 0x106   : > { %v433_v30 = vrot.slane %v432_v29, 1 }
 0x108   : > { %v434_v31 = vadd.f32 %v433_v30, %v432_v29 }
 0x10a   : > { %v436_v32 = vmul.f32 0.0625, %v434_v31 }
 0x10c   : > { %v437_v33 = vsub.f32 %v420_v23, %v436_v32  ;;  %v438_v34 = vsub.f32 %v425_v24, %v436_v32 }
 0x10e   : > { %v439_v35 = vmul.f32 %v437_v33, %v437_v33  ;;  %v440_v36 = vmul.f32 %v438_v34, %v438_v34 }
 0x110   : > { %v441_v37 = vadd.f32 %v440_v36, %v439_v35 }
 0x112   : > { %v442_v38 = vrot.slane %v441_v37, 4 }
 0x114   : > { %v443_v39 = vadd.f32 %v442_v38, %v441_v37 }
 0x116   : > { %v444_v40 = vrot.slane %v443_v39, 2 }
 0x118   : > { %v445_v41 = vadd.f32 %v444_v40, %v443_v39 }
 0x11a   : > { %v446_v42 = vrot.slane %v445_v41, 1 }
 0x11c   : > { %v447_v43 = vadd.f32 %v446_v42, %v445_v41 }
 0x11e   : > { %v448_v44 = vmul.f32 0.0625, %v447_v43 }
 0x120   : > { %v449_v45 = vadd.f32 1e-05, %v448_v44 }
 0x122   : > { %616 = vrsqrt.f32 %v449_v45 }
 0x12f   : > { %v617_v46 = vpop.eup %616 }
 0x130   : > { %v451_v48 = vmul.f32 %v617_v46, %v437_v33  ;;  %v452_v49 = vmul.f32 %v617_v46, %v438_v34 }
 0x132   : > { %vm454_vm0 = vcmp.ge.f32.partialorder %v451_v48, 0.0  ;;  %vm455_vm1 = vcmp.ge.f32.partialorder %v452_v49, 0.0  ;;  %v457_v50 = vmul.f32 %v456_v47, %v451_v48  ;;  %v458_v51 = vmul.f32 %v456_v47, %v452_v49 }
 0x134   : > { %v459_v52 = vsel %vm454_vm0, %v451_v48, %v457_v50  ;;  %v460_v53 = vsel %vm455_vm1, %v452_v49, %v458_v51 }
 0x135   : > { %461 = vst [vmem:[%s198_s6] sm:$0xff] %v459_v52  ;;  %462 = vst [vmem:[%s198_s6 + $0x8] sm:$0xff] %v460_v53 }
 0x136 PF: > { %s15_s17 = sadd.s32 1, %s624_s17  }
 0x137   : > { %p12_p4 = scmp.ge.s32.totalorder %s15_s17, 4  }
 0x139   :  { %14 = sbr.rel (!%p12_p4) target bundleno = 2 (0x2), region = 66 }

// kernel: tile.29
= control target key start
LH: loop header
LB: loop body
LE: loop exit
PB: predicated region body
PF: predicated region fallthrough
CT: control target
= control target key end

     0   :  { %vm6_vm0 = vcmask 1043458   ;;  %vm10_vm1 = vcmask 1045508   ;;  %vm14_vm2 = vcmask 1047558   ;;  %s19_s6 = smov 3  ;;  %s22_s7 = smov 12  ;;  %vm16_vm3 = vcmask 64512   ;;  %s736_s0 = inlined_call_operand.vmem [shape: f32[8,16,8], index: 0, kind: input, shape index: {}]   ;;  %s737_s1 = inlined_call_operand.vmem [shape: f32[8,128], index: 1, kind: output, shape index: {}]  }
   0x1   :  { %v348_v0 = vld [vmem:[%s736_s0 + $0xf] ss:$16 sm:%s19_s6]   ;;  %s27_s12 = smov 48  ;;  %s32_s13 = smov 192  ;;  %vm38_vm4 = vcmask 1048512   ;;  %vm60_vm5 = vcmask 982912  }
   0x2   :  { %v349_v1 = vld [vmem:[%s736_s0 + $0xf] ss:$16 sm:%s22_s7]   ;;  %s63_s18 = smov 3  ;;  %s66_s21 = smov 12  ;;  %vm82_vm6 = vcmask 917312   ;;  %vm104_vm7 = vcmask 851712  }
   0x3   :  { %v25_v2 = vsel %vm6_vm0, %v349_v1, %v348_v0  ;;  %v350_v3 = vld [vmem:[%s736_s0 + $0xf] ss:$16 sm:%s27_s12]   ;;  %v356_v6 = vld [vmem:[%s736_s0 + $0xd] ss:$16 sm:%s63_s18]   ;;  %s71_s22 = smov 48  ;;  %s76_s27 = smov 192 }
   0x4   :  { %v351_v4 = vld [vmem:[%s736_s0 + $0xf] ss:$16 sm:%s32_s13]   ;;  %v30_v5 = vsel %vm10_vm1, %v350_v3, %v25_v2  ;;  %v357_v8 = vld [vmem:[%s736_s0 + $0xd] ss:$16 sm:%s66_s21]   ;;  %s423_s28 = smov 120   ;;  %s41_s2 = smov 3 }
   0x5   :  { %v35_v7 = vsel %vm14_vm2, %v351_v4, %v30_v5  ;;  %v358_v9 = vld [vmem:[%s736_s0 + $0xd] ss:$16 sm:%s71_s22]   ;;  %v69_v10 = vsel %vm6_vm0, %v357_v8, %v356_v6  ;;  %s44_s3 = smov 12  ;;  %v352_v13 = vld [vmem:[%s736_s0 + $0xe] ss:$16 sm:%s41_s2]   ;;  %s49_s8 = smov 48 }
   0x6   :  { %36 = vrot.lane.b32.xlu0 %v35_v7, %s423_s28  ;;  %v359_v11 = vld [vmem:[%s736_s0 + $0xd] ss:$16 sm:%s76_s27]   ;;  %v74_v12 = vsel %vm10_vm1, %v358_v9, %v69_v10  ;;  %s54_s9 = smov 192  ;;  %s85_s14 = smov 3  ;;  %vm126_vm8 = vcmask 786112   ;;  %vm148_vm9 = vcmask 720512  }
   0x7   :  { %v353_v14 = vld [vmem:[%s736_s0 + $0xe] ss:$16 sm:%s44_s3]   ;;  %v79_v15 = vsel %vm14_vm2, %v359_v11, %v74_v12  ;;  %s424_s15 = smov 104   ;;  %v360_v20 = vld [vmem:[%s736_s0 + $0xc] ss:$16 sm:%s85_s14]   ;;  %s88_s18 = smov 12 }
   0x8   :  { %v47_v16 = vsel %vm6_vm0, %v353_v14, %v352_v13  ;;  %v354_v17 = vld [vmem:[%s736_s0 + $0xe] ss:$16 sm:%s49_s8]   ;;  %80 = vrot.lane.b32.xlu1 %v79_v15, %s424_s15  ;;  %s93_s19 = smov 48  ;;  %s98_s24 = smov 192  ;;  %vm170_vm10 = vcmask 654912   ;;  %vm192_vm11 = vcmask 589312  }
   0x9   :  { %v355_v18 = vld [vmem:[%s736_s0 + $0xe] ss:$16 sm:%s54_s9]   ;;  %v52_v19 = vsel %vm10_vm1, %v354_v17, %v47_v16  ;;  %v361_v22 = vld [vmem:[%s736_s0 + $0xc] ss:$16 sm:%s88_s18]   ;;  %s425_s25 = smov 112   ;;  %s107_s28 = smov 3 }
   0xa   :  { %v57_v21 = vsel %vm14_vm2, %v355_v18, %v52_v19  ;;  %v362_v23 = vld [vmem:[%s736_s0 + $0xc] ss:$16 sm:%s93_s19]   ;;  %v91_v24 = vsel %vm6_vm0, %v361_v22, %v360_v20  ;;  %s110_s29 = smov 12  ;;  %v364_v27 = vld [vmem:[%s736_s0 + $0xb] ss:$16 sm:%s107_s28]   ;;  %s115_s5 = smov 48 }
   0xb   :  { %58 = vrot.lane.b32.xlu0 %v57_v21, %s425_s25  ;;  %v363_v25 = vld [vmem:[%s736_s0 + $0xc] ss:$16 sm:%s98_s24]   ;;  %v96_v26 = vsel %vm10_vm1, %v362_v23, %v91_v24  ;;  %s120_s6 = smov 192  ;;  %s129_s11 = smov 3  ;;  %vm214_vm12 = vcmask 523712   ;;  %vm236_vm13 = vcmask 458112  }
   0xc   :  { %v365_v28 = vld [vmem:[%s736_s0 + $0xb] ss:$16 sm:%s110_s29]   ;;  %v101_v29 = vsel %vm14_vm2, %v363_v25, %v96_v26  ;;  %s426_s12 = smov 96   ;;  %v368_v34 = vld [vmem:[%s736_s0 + $0xa] ss:$16 sm:%s129_s11]   ;;  %s132_s15 = smov 12 }
   0xd   :  { %v113_v30 = vsel %vm6_vm0, %v365_v28, %v364_v27  ;;  %v366_v31 = vld [vmem:[%s736_s0 + $0xb] ss:$16 sm:%s115_s5]   ;;  %102 = vrot.lane.b32.xlu1 %v101_v29, %s426_s12  ;;  %s137_s16 = smov 48  ;;  %s142_s21 = smov 192  ;;  %vm258_vm14 = vcmask 392512   ;;  %vm280_vm15 = vcmask 326912  }
   0xe   :  { %v367_v32 = vld [vmem:[%s736_s0 + $0xb] ss:$16 sm:%s120_s6]   ;;  %v118_v33 = vsel %vm10_vm1, %v366_v31, %v113_v30  ;;  %v369_v36 = vld [vmem:[%s736_s0 + $0xa] ss:$16 sm:%s132_s15]   ;;  %s427_s22 = smov 88   ;;  %s151_s25 = smov 3 }
   0xf   :  { %v123_v35 = vsel %vm14_vm2, %v367_v32, %v118_v33  ;;  %v370_v37 = vld [vmem:[%s736_s0 + $0xa] ss:$16 sm:%s137_s16]   ;;  %v135_v38 = vsel %vm6_vm0, %v369_v36, %v368_v34  ;;  %s154_s26 = smov 12  ;;  %v372_v41 = vld [vmem:[%s736_s0 + $0x9] ss:$16 sm:%s151_s25]   ;;  %s159_s2 = smov 48 }
  0x10   :  { %124 = vrot.lane.b32.xlu0 %v123_v35, %s427_s22  ;;  %v371_v39 = vld [vmem:[%s736_s0 + $0xa] ss:$16 sm:%s142_s21]   ;;  %v140_v40 = vsel %vm10_vm1, %v370_v37, %v135_v38  ;;  %s164_s3 = smov 192  ;;  %s173_s8 = smov 3 }
  0x11   :  { %v373_v42 = vld [vmem:[%s736_s0 + $0x9] ss:$16 sm:%s154_s26]   ;;  %v145_v43 = vsel %vm14_vm2, %v371_v39, %v140_v40  ;;  %s428_s9 = smov 80   ;;  %v376_v48 = vld [vmem:[%s736_s0 + $0x8] ss:$16 sm:%s173_s8]   ;;  %s176_s12 = smov 12 }
  0x12   :  { %v157_v44 = vsel %vm6_vm0, %v373_v42, %v372_v41  ;;  %v374_v45 = vld [vmem:[%s736_s0 + $0x9] ss:$16 sm:%s159_s2]   ;;  %146 = vrot.lane.b32.xlu1 %v145_v43, %s428_s9  ;;  %s181_s13 = smov 48  ;;  %s186_s18 = smov 192 }
  0x13   :  { %v375_v46 = vld [vmem:[%s736_s0 + $0x9] ss:$16 sm:%s164_s3]   ;;  %v162_v47 = vsel %vm10_vm1, %v374_v45, %v157_v44  ;;  %v377_v50 = vld [vmem:[%s736_s0 + $0x8] ss:$16 sm:%s176_s12]   ;;  %s429_s19 = smov 72   ;;  %s195_s22 = smov 3 }
  0x14   :  { %v167_v49 = vsel %vm14_vm2, %v375_v46, %v162_v47  ;;  %v378_v51 = vld [vmem:[%s736_s0 + $0x8] ss:$16 sm:%s181_s13]   ;;  %v179_v52 = vsel %vm6_vm0, %v377_v50, %v376_v48  ;;  %s198_s23 = smov 12  ;;  %v380_v55 = vld [vmem:[%s736_s0 + $0x7] ss:$16 sm:%s195_s22]   ;;  %s203_s28 = smov 48 }
  0x15   :  { %168 = vrot.lane.b32.xlu0 %v167_v49, %s429_s19  ;;  %v379_v53 = vld [vmem:[%s736_s0 + $0x8] ss:$16 sm:%s186_s18]   ;;  %v184_v54 = vsel %vm10_vm1, %v378_v51, %v179_v52  ;;  %s208_s29 = smov 192  ;;  %s217_s5 = smov 3 }
  0x16   :  { %v381_v56 = vld [vmem:[%s736_s0 + $0x7] ss:$16 sm:%s198_s23]   ;;  %v189_v57 = vsel %vm14_vm2, %v379_v53, %v184_v54  ;;  %s430_s6 = smov 64   ;;  %v384_v62 = vld [vmem:[%s736_s0 + $0x6] ss:$16 sm:%s217_s5]   ;;  %s220_s9 = smov 12 }
  0x17   :  { %v201_v58 = vsel %vm6_vm0, %v381_v56, %v380_v55  ;;  %v382_v59 = vld [vmem:[%s736_s0 + $0x7] ss:$16 sm:%s203_s28]   ;;  %190 = vrot.lane.b32.xlu1 %v189_v57, %s430_s6  ;;  %s225_s10 = smov 48  ;;  %s230_s15 = smov 192 }
  0x18   :  { %v383_v60 = vld [vmem:[%s736_s0 + $0x7] ss:$16 sm:%s208_s29]   ;;  %v206_v61 = vsel %vm10_vm1, %v382_v59, %v201_v58  ;;  %v385_v0 = vld [vmem:[%s736_s0 + $0x6] ss:$16 sm:%s220_s9]   ;;  %s431_s16 = smov 56   ;;  %s239_s19 = smov 3 }
  0x19   :  { %v211_v63 = vsel %vm14_vm2, %v383_v60, %v206_v61  ;;  %v386_v1 = vld [vmem:[%s736_s0 + $0x6] ss:$16 sm:%s225_s10]   ;;  %v223_v2 = vsel %vm6_vm0, %v385_v0, %v384_v62  ;;  %s242_s20 = smov 12  ;;  %v388_v5 = vld [vmem:[%s736_s0 + $0x5] ss:$16 sm:%s239_s19]   ;;  %s247_s25 = smov 48 }
  0x1a   :  { %212 = vrot.lane.b32.xlu0 %v211_v63, %s431_s16  ;;  %v387_v3 = vld [vmem:[%s736_s0 + $0x6] ss:$16 sm:%s230_s15]   ;;  %v228_v4 = vsel %vm10_vm1, %v386_v1, %v223_v2  ;;  %s252_s26 = smov 192  ;;  %s261_s2 = smov 3 }
  0x1b   :  { %v389_v6 = vld [vmem:[%s736_s0 + $0x5] ss:$16 sm:%s242_s20]   ;;  %v233_v7 = vsel %vm14_vm2, %v387_v3, %v228_v4  ;;  %s432_s3 = smov 48   ;;  %v392_v12 = vld [vmem:[%s736_s0 + $0x4] ss:$16 sm:%s261_s2]   ;;  %s264_s6 = smov 12 }
  0x1c   :  { %v245_v8 = vsel %vm6_vm0, %v389_v6, %v388_v5  ;;  %v390_v9 = vld [vmem:[%s736_s0 + $0x5] ss:$16 sm:%s247_s25]   ;;  %234 = vrot.lane.b32.xlu1 %v233_v7, %s432_s3  ;;  %s269_s7 = smov 48  ;;  %s274_s12 = smov 192 }
  0x1d   :  { %v391_v10 = vld [vmem:[%s736_s0 + $0x5] ss:$16 sm:%s252_s26]   ;;  %v250_v11 = vsel %vm10_vm1, %v390_v9, %v245_v8  ;;  %v393_v14 = vld [vmem:[%s736_s0 + $0x4] ss:$16 sm:%s264_s6]   ;;  %s433_s13 = smov 40   ;;  %s283_s16 = smov 3 }
  0x1e   :  { %v255_v13 = vsel %vm14_vm2, %v391_v10, %v250_v11  ;;  %v394_v15 = vld [vmem:[%s736_s0 + $0x4] ss:$16 sm:%s269_s7]   ;;  %v267_v16 = vsel %vm6_vm0, %v393_v14, %v392_v12  ;;  %s286_s17 = smov 12  ;;  %v396_v19 = vld [vmem:[%s736_s0 + $0x3] ss:$16 sm:%s283_s16]   ;;  %s291_s22 = smov 48 }
  0x1f   :  { %256 = vrot.lane.b32.xlu0 %v255_v13, %s433_s13  ;;  %v395_v17 = vld [vmem:[%s736_s0 + $0x4] ss:$16 sm:%s274_s12]   ;;  %v272_v18 = vsel %vm10_vm1, %v394_v15, %v267_v16  ;;  %s296_s23 = smov 192  ;;  %s305_s28 = smov 3 }
  0x20   :  { %v397_v20 = vld [vmem:[%s736_s0 + $0x3] ss:$16 sm:%s286_s17]   ;;  %v277_v21 = vsel %vm14_vm2, %v395_v17, %v272_v18  ;;  %s434_s29 = smov 32   ;;  %v400_v26 = vld [vmem:[%s736_s0 + $0x2] ss:$16 sm:%s305_s28]   ;;  %s308_s3 = smov 12 }
  0x21   :  { %v289_v22 = vsel %vm6_vm0, %v397_v20, %v396_v19  ;;  %v398_v23 = vld [vmem:[%s736_s0 + $0x3] ss:$16 sm:%s291_s22]   ;;  %278 = vrot.lane.b32.xlu1 %v277_v21, %s434_s29  ;;  %s313_s4 = smov 48  ;;  %s318_s9 = smov 192 }
  0x22   :  { %v399_v24 = vld [vmem:[%s736_s0 + $0x3] ss:$16 sm:%s296_s23]   ;;  %v294_v25 = vsel %vm10_vm1, %v398_v23, %v289_v22  ;;  %v401_v28 = vld [vmem:[%s736_s0 + $0x2] ss:$16 sm:%s308_s3]   ;;  %s435_s10 = smov 24   ;;  %s327_s13 = smov 3 }
  0x23   :  { %v299_v27 = vsel %vm14_vm2, %v399_v24, %v294_v25  ;;  %v402_v29 = vld [vmem:[%s736_s0 + $0x2] ss:$16 sm:%s313_s4]   ;;  %v311_v30 = vsel %vm6_vm0, %v401_v28, %v400_v26  ;;  %s330_s14 = smov 12  ;;  %v404_v33 = vld [vmem:[%s736_s0 + $0x1] ss:$16 sm:%s327_s13]   ;;  %s335_s19 = smov 48 }
  0x24   :  { %300 = vrot.lane.b32.xlu0 %v299_v27, %s435_s10  ;;  %v403_v31 = vld [vmem:[%s736_s0 + $0x2] ss:$16 sm:%s318_s9]   ;;  %v316_v32 = vsel %vm10_vm1, %v402_v29, %v311_v30  ;;  %s340_s20 = smov 192  ;;  %s2_s25 = smov 3 }
  0x25   :  { %v405_v34 = vld [vmem:[%s736_s0 + $0x1] ss:$16 sm:%s330_s14]   ;;  %v321_v35 = vsel %vm14_vm2, %v403_v31, %v316_v32  ;;  %s436_s26 = smov 16   ;;  %s4_s27 = smov 12  ;;  %v3_v40 = vld [vmem:[%s736_s0] ss:$16 sm:%s2_s25]  }
  0x26   :  { %v333_v36 = vsel %vm6_vm0, %v405_v34, %v404_v33  ;;  %v406_v37 = vld [vmem:[%s736_s0 + $0x1] ss:$16 sm:%s335_s19]   ;;  %322 = vrot.lane.b32.xlu1 %v321_v35, %s436_s26  ;;  %s8_s28 = smov 48  ;;  %s12_s2 = smov 192 }
  0x27   :  { %v407_v38 = vld [vmem:[%s736_s0 + $0x1] ss:$16 sm:%s340_s20]   ;;  %v338_v39 = vsel %vm10_vm1, %v406_v37, %v333_v36  ;;  %v5_v42 = vld [vmem:[%s736_s0] ss:$16 sm:%s4_s27]   ;;  %s437_s7 = smov 8  }
  0x28   :  { %v343_v41 = vsel %vm14_vm2, %v407_v38, %v338_v39  ;;  %v9_v43 = vld [vmem:[%s736_s0] ss:$16 sm:%s8_s28]   ;;  %v7_v44 = vsel %vm6_vm0, %v5_v42, %v3_v40  ;;  %vm302_vm0 = vcmask 261312  }
  0x29   :  { %344 = vrot.lane.b32.xlu0 %v343_v41, %s437_s7  ;;  %v13_v45 = vld [vmem:[%s736_s0] ss:$16 sm:%s12_s2]   ;;  %v11_v46 = vsel %vm10_vm1, %v9_v43, %v7_v44  ;;  %vm324_vm1 = vcmask 195712  }
  0x2a   :  { %v15_v47 = vsel %vm14_vm2, %v13_v45, %v11_v46  ;;  %vm346_vm2 = vcmask 130112  }
  0x2b   :  { %17 = vst.msk [vmem:[%s737_s1] sm:$0xff] %vm16_vm3, %v15_v47  }
  0x78   :  { %v37_v48 = vpop.permute.xlu0 %36  }
  0x79   :  { %39 = vst.msk [vmem:[%s737_s1] sm:$0xff] %vm38_vm4, %v37_v48  }
  0x7a   :  { %v81_v49 = vpop.permute.xlu1 %80  }
  0x7d   :  { %v59_v50 = vpop.permute.xlu0 %58  }
  0x7e   :  { %61 = vst.msk [vmem:[%s737_s1] sm:$0xff] %vm60_vm5, %v59_v50  }
  0x7f   :  { %83 = vst.msk [vmem:[%s737_s1] sm:$0xff] %vm82_vm6, %v81_v49   ;;  %v103_v51 = vpop.permute.xlu1 %102  }
  0x80   :  { %105 = vst.msk [vmem:[%s737_s1] sm:$0xff] %vm104_vm7, %v103_v51  }
  0x82   :  { %v125_v52 = vpop.permute.xlu0 %124  }
  0x83   :  { %127 = vst.msk [vmem:[%s737_s1] sm:$0xff] %vm126_vm8, %v125_v52  }
  0x84   :  { %v147_v53 = vpop.permute.xlu1 %146  }
  0x85   :  { %149 = vst.msk [vmem:[%s737_s1] sm:$0xff] %vm148_vm9, %v147_v53  }
  0x87   :  { %v169_v54 = vpop.permute.xlu0 %168  }
  0x88   :  { %171 = vst.msk [vmem:[%s737_s1] sm:$0xff] %vm170_vm10, %v169_v54  }
  0x89   :  { %v191_v55 = vpop.permute.xlu1 %190  }
  0x8a   :  { %193 = vst.msk [vmem:[%s737_s1] sm:$0xff] %vm192_vm11, %v191_v55  }
  0x8c   :  { %v213_v56 = vpop.permute.xlu0 %212  }
  0x8d   :  { %215 = vst.msk [vmem:[%s737_s1] sm:$0xff] %vm214_vm12, %v213_v56  }
  0x8e   :  { %v235_v57 = vpop.permute.xlu1 %234  }
  0x8f   :  { %237 = vst.msk [vmem:[%s737_s1] sm:$0xff] %vm236_vm13, %v235_v57  }
  0x91   :  { %v257_v58 = vpop.permute.xlu0 %256  }
  0x92   :  { %259 = vst.msk [vmem:[%s737_s1] sm:$0xff] %vm258_vm14, %v257_v58  }
  0x93   :  { %v279_v59 = vpop.permute.xlu1 %278  }
  0x94   :  { %281 = vst.msk [vmem:[%s737_s1] sm:$0xff] %vm280_vm15, %v279_v59  }
  0x96   :  { %v301_v60 = vpop.permute.xlu0 %300  }
  0x97   :  { %303 = vst.msk [vmem:[%s737_s1] sm:$0xff] %vm302_vm0, %v301_v60  }
  0x98   :  { %v323_v61 = vpop.permute.xlu1 %322  }
  0x99   :  { %325 = vst.msk [vmem:[%s737_s1] sm:$0xff] %vm324_vm1, %v323_v61  }
  0x9b   :  { %v345_v62 = vpop.permute.xlu0 %344  }
  0x9c   :  { %347 = vst.msk [vmem:[%s737_s1] sm:$0xff] %vm346_vm2, %v345_v62  }

// kernel: tile.18
= control target key start
LH: loop header
LB: loop body
LE: loop exit
PB: predicated region body
PF: predicated region fallthrough
CT: control target
= control target key end

     0   :  { %s28_s0 = inlined_call_operand.vmem [shape: f32[8], index: 0, kind: input, shape index: {}]   ;;  %s29_s1 = inlined_call_operand.vmem [shape: f32[16,8], index: 1, kind: output, shape index: {}]  }
   0x1   :  { %v4_v0 = vld [vmem:[%s28_s0] ss:$0 sm:$0xff] }
   0x2   :  { %5 = vst [vmem:[%s29_s1] sm:$0xff] %v4_v0  ;;  %8 = vst [vmem:[%s29_s1 + $0x8] sm:$0xff] %v4_v0 }

// kernel: d_down_block.6
= control target key start
LH: loop header
LB: loop body
LE: loop exit
PB: predicated region body
PF: predicated region fallthrough
CT: control target
= control target key end

     0   :  { %s1071_s26 = smov 0   ;;  %s1191_s0 = inlined_call_operand.vmem [shape: f32[2,16,72], index: 0, kind: input, shape index: {}]   ;;  %s1192_s1 = inlined_call_operand.vmem [shape: f32[72,128], index: 1, kind: input, shape index: {}]   ;;  %s1193_s2 = inlined_call_operand.vmem [shape: f32[1,128], index: 2, kind: input, shape index: {}]   ;;  %s1194_s3 = inlined_call_operand.vmem [shape: f32[128,8], index: 3, kind: input, shape index: {}]   ;;  %s1195_s4 = inlined_call_operand.vmem [shape: f32[8,128], index: 4, kind: input, shape index: {}]   ;;  %s1196_s5 = inlined_call_operand.<no memory space> [shape: f32[1,1], index: 5, kind: input, shape index: {}]   ;;  %s1197_s6 = inlined_call_operand.vmem [shape: f32[2,16,128], index: 6, kind: input, shape index: {}]   ;;  %s1198_s7 = inlined_call_operand.vmem [shape: f32[2,16,128], index: 7, kind: output, shape index: {}]  }
   0x1   :  { %12 = sst [smem:[#allocation2]] %s1196_s5 }
   0x2 LB: > { %s833_s27 = sadd.s32 4294967295, %s1024_s26   ;;  %p837_p0 = scmp.ge.s32.totalorder %s1024_s26, 1  ;;  %s1024_s26 = sphi %s1071_s26, %s18_s26  }
   0x3   : > { %p248_p1 = scmp.lt.s32.totalorder %s1024_s26, 3 }
   0x5   : > { %p249_p2 = pnand %p837_p0, %p248_p1 }
   0x6   : > { %p285_p3 = scmp.lt.s32.totalorder (!%p249_p2), %s833_s27, 1  ;;  %s750_s18 = sld [smem:[#allocation2]] (!%p249_p2) }
   0x7   : > { %252 = sbr.rel (%p249_p2) target bundleno = 1072 (0x430), region = 48 }
   0xc   : > { %v310_v0 = vld [vmem:[%s1192_s1 + $0x40] sm:$0xff]  ;;  %v309_v1 = vld [vmem:[%s1192_s1 + $0x38] sm:$0xff]  ;;  %v308_v2 = vld [vmem:[%s1192_s1 + $0x30] sm:$0xff]  ;;  %s1200_s27 = smov (!%p285_p3, %s833_s27), 1  ;;  %vm318_vm0 = vcmask 588800   ;;  %v1026_v32 = vmov 0.0   ;;  %v577_v46 = vlaneseq }
   0xd   : > { %905 = vmatprep.subr.mxu0 %v310_v0  ;;  %v415_v3 = vld [vmem:[%s1194_s3 + $0x78] sm:$0xff]  ;;  %v414_v4 = vld [vmem:[%s1194_s3 + $0x70] sm:$0xff]  ;;  %v307_v5 = vld [vmem:[%s1192_s1 + $0x28] sm:$0xff]  ;;  %s1097_s16 = sshll.u32 %s1200_s27, 4  ;;  %vm1027_vm1 = vmmov 0   ;;  %vm491_vm2 = vcmask 64512  }
   0xe   : > { %906 = vmatpush3.msra.mxu0 %v310_v0  ;;  %926 = vmatprep.subr.mxu1 %v415_v3  ;;  %s1103_s19 = scalar_lea.vmem %s1191_s0, %s1097_s16  ;;  %v306_v6 = vld [vmem:[%s1192_s1 + $0x20] sm:$0xff]  ;;  %v413_v8 = vld [vmem:[%s1194_s3 + $0x68] sm:$0xff]  ;;  %v305_v9 = vld [vmem:[%s1192_s1 + $0x18] sm:$0xff]  ;;  %v578_v47 = vshrl.u32 %v577_v46, 7  ;;  %s294_s22 = scalar_lea.vmem %s1197_s6, %s1097_s16 }
   0xf   : > { %907 = vmatprep.subr.mxu0 %v309_v1  ;;  %927 = vmatpush3.msra.mxu1 %v415_v3  ;;  %v300_v7 = vld [vmem:[%s1103_s19] sm:$0xff]  ;;  %v304_v11 = vld [vmem:[%s1192_s1 + $0x10] sm:$0xff]  ;;  %v411_v12 = vld [vmem:[%s1194_s3 + $0x58] sm:$0xff] }
  0x10   : > { %908 = vmatpush3.msra.mxu0 %v309_v1  ;;  %928 = vmatprep.subr.mxu1 %v414_v4  ;;  %v412_v10 = vld [vmem:[%s1194_s3 + $0x60] sm:$0xff]  ;;  %v303_v13 = vld [vmem:[%s1192_s1 + $0x8] sm:$0xff]  ;;  %v410_v14 = vld [vmem:[%s1194_s3 + $0x50] sm:$0xff]  ;;  %v579_v48 = vsub.s32 0, %v578_v47 }
  0x11   : > { %909 = vmatprep.subr.mxu0 %v308_v2  ;;  %923 = vmatprep.mubr.msk.f32.mxu0 %vm318_vm0, %v300_v7  ;;  %v302_v15 = vld [vmem:[%s1192_s1] sm:$0xff]  ;;  %v409_v16 = vld [vmem:[%s1194_s3 + $0x48] sm:$0xff]  ;;  %v407_v19 = vld [vmem:[%s1194_s3 + $0x38] sm:$0xff] }
  0x12   : > { %910 = vmatpush3.msra.mxu0 %v308_v2  ;;  %929 = vmatpush3.msra.mxu1 %v414_v4  ;;  %v301_v17 = vld [vmem:[%s1103_s19 + $0x8] sm:$0xff]  ;;  %v408_v18 = vld [vmem:[%s1194_s3 + $0x40] sm:$0xff]  ;;  %v406_v20 = vld [vmem:[%s1194_s3 + $0x30] sm:$0xff]  ;;  %s299_s19 = scalar_lea.vmem %s1198_s7, %s1097_s16 }
  0x13   : > { %911 = vmatprep.subr.mxu0 %v307_v5  ;;  %930 = vmatprep.subr.mxu1 %v413_v8  ;;  %v405_v21 = vld [vmem:[%s1194_s3 + $0x28] sm:$0xff]  ;;  %v404_v22 = vld [vmem:[%s1194_s3 + $0x20] sm:$0xff]  ;;  %v403_v23 = vld [vmem:[%s1194_s3 + $0x18] sm:$0xff] }
  0x14   : > { %912 = vmatpush3.msra.mxu0 %v307_v5  ;;  %931 = vmatpush3.msra.mxu1 %v413_v8  ;;  %v402_v24 = vld [vmem:[%s1194_s3 + $0x10] sm:$0xff]  ;;  %v401_v25 = vld [vmem:[%s1194_s3 + $0x8] sm:$0xff]  ;;  %v400_v26 = vld [vmem:[%s1194_s3] sm:$0xff] }
  0x15   : > { %913 = vmatprep.subr.mxu0 %v306_v6  ;;  %932 = vmatprep.subr.mxu1 %v412_v10  ;;  %v844_v28 = vld [vmem:[%s1193_s2] ss:$0 sm:$0xff] }
  0x16   : > { %914 = vmatpush3.msra.mxu0 %v306_v6  ;;  %933 = vmatpush3.msra.mxu1 %v412_v10  ;;  %v503_v33 = vld [vmem:[%s1195_s4] sm:$0xff] }
  0x17   : > { %915 = vmatprep.subr.mxu0 %v305_v9  ;;  %934 = vmatprep.subr.mxu1 %v411_v12 }
  0x18   : > { %916 = vmatpush3.msra.mxu0 %v305_v9  ;;  %935 = vmatpush3.msra.mxu1 %v411_v12  ;;  %v759_v9 = vld [vmem:[%s294_s22 + $0x8] sm:$0xff] }
  0x19   : > { %917 = vmatprep.subr.mxu0 %v304_v11  ;;  %936 = vmatprep.subr.mxu1 %v410_v14 }
  0x1a   : > { %918 = vmatpush3.msra.mxu0 %v304_v11  ;;  %937 = vmatpush3.msra.mxu1 %v410_v14  ;;  %v753_v11 = vstv %s750_s18 }
  0x1b   : > { %919 = vmatprep.subr.mxu0 %v303_v13  ;;  %938 = vmatprep.subr.mxu1 %v409_v16 }
  0x1c   : > { %920 = vmatpush3.msra.mxu0 %v303_v13  ;;  %939 = vmatpush3.msra.mxu1 %v409_v16 }
  0x1d   : > { %921 = vmatprep.subr.mxu0 %v302_v15  ;;  %940 = vmatprep.subr.mxu1 %v408_v18 }
  0x1e   : > { %922 = vmatpush3.msra.mxu0 %v302_v15  ;;  %941 = vmatpush3.msra.mxu1 %v408_v18  ;;  %v761_v15 = vmul.f32 -1.0, %v759_v9 }
  0x1f   : > { %924 = vmatmul.mubr.msk.f32.vlgmr.msra.gmra.mxu0 %vm318_vm0, %v301_v17  ;;  %966 = vmatprep.subr.mxu0 %v415_v3 }
  0x20   : > { %942 = vmatprep.subr.mxu1 %v407_v19  ;;  %967 = vmatpush3.msra.mxu0 %v415_v3 }
  0x21   : > { %943 = vmatpush3.msra.mxu1 %v407_v19  ;;  %968 = vmatprep.subr.mxu0 %v414_v4 }
  0x22   : > { %944 = vmatprep.subr.mxu1 %v406_v20  ;;  %969 = vmatpush3.msra.mxu0 %v414_v4 }
  0x23   : > { %945 = vmatpush3.msra.mxu1 %v406_v20  ;;  %970 = vmatprep.subr.mxu0 %v413_v8 }
  0x24   : > { %946 = vmatprep.subr.mxu1 %v405_v21  ;;  %971 = vmatpush3.msra.mxu0 %v413_v8  ;;  %v758_v8 = vld [vmem:[%s294_s22] sm:$0xff] }
  0x25   : > { %947 = vmatpush3.msra.mxu1 %v405_v21  ;;  %972 = vmatprep.subr.mxu0 %v412_v10 }
  0x26   : > { %948 = vmatprep.subr.mxu1 %v404_v22  ;;  %973 = vmatpush3.msra.mxu0 %v412_v10 }
  0x27   : > { %949 = vmatpush3.msra.mxu1 %v404_v22  ;;  %974 = vmatprep.subr.mxu0 %v411_v12 }
  0x28   : > { %950 = vmatprep.subr.mxu1 %v403_v23  ;;  %975 = vmatpush3.msra.mxu0 %v411_v12 }
  0x29   : > { %951 = vmatpush3.msra.mxu1 %v403_v23  ;;  %976 = vmatprep.subr.mxu0 %v410_v14 }
  0x2a   : > { %977 = vmatpush3.msra.mxu0 %v410_v14  ;;  %952 = vmatprep.subr.mxu1 %v402_v24  ;;  %v760_v14 = vmul.f32 -1.0, %v758_v8 }
  0x2b   : > { %978 = vmatprep.subr.mxu0 %v409_v16  ;;  %953 = vmatpush3.msra.mxu1 %v402_v24 }
  0x2c   : > { %979 = vmatpush3.msra.mxu0 %v409_v16  ;;  %954 = vmatprep.subr.mxu1 %v401_v25 }
  0x2d   : > { %980 = vmatprep.subr.mxu0 %v408_v18  ;;  %955 = vmatpush3.msra.mxu1 %v401_v25 }
  0x2e   : > { %981 = vmatpush3.msra.mxu0 %v408_v18  ;;  %956 = vmatprep.subr.mxu1 %v400_v26 }
  0x2f   : > { %982 = vmatprep.subr.mxu0 %v407_v19  ;;  %957 = vmatpush3.msra.mxu1 %v400_v26 }
  0x30   : > { %983 = vmatpush3.msra.mxu0 %v407_v19  ;;  %961 = vmatprep.subr.mxu1 %v1026_v32 }
  0x31   : > { %984 = vmatprep.subr.mxu0 %v406_v20 }
  0x32   : > { %985 = vmatpush3.msra.mxu0 %v406_v20 }
  0x33   : > { %986 = vmatprep.subr.mxu0 %v405_v21 }
  0x34   : > { %987 = vmatpush3.msra.mxu0 %v405_v21 }
  0x35   : > { %988 = vmatprep.subr.mxu0 %v404_v22 }
  0x36   : > { %989 = vmatpush3.msra.mxu0 %v404_v22 }
  0x37   : > { %990 = vmatprep.subr.mxu0 %v403_v23 }
  0x38   : > { %991 = vmatpush3.msra.mxu0 %v403_v23 }
  0x39   : > { %992 = vmatprep.subr.mxu0 %v402_v24 }
  0x3a   : > { %993 = vmatpush3.msra.mxu0 %v402_v24 }
  0x3b   : > { %994 = vmatprep.subr.mxu0 %v401_v25 }
  0x3c   : > { %995 = vmatpush3.msra.mxu0 %v401_v25 }
  0x3d   : > { %996 = vmatprep.subr.mxu0 %v400_v26 }
  0x3e   : > { %997 = vmatpush3.msra.mxu0 %v400_v26 }
  0xdf   : > { %v925_v27 = vpop.f32.mrf.mxu0 }
  0xe0   : > { %v397_v31 = vadd.f32 %v925_v27, %v844_v28 }
  0xe1   : > { %v391_v29 = vpop.f32.mrf.mxu0 }
  0xe2   : > { %v392_v30 = vadd.f32 %v844_v28, %v391_v29 }
  0xe4   : > { %958 = vmatprep.mubr.f32.mxu1 %v392_v30 }
  0xe5   : > { %959 = vmatmul.mubr.f32.vlgmr.msra.gmra.mxu1 %v397_v31 }
  0xe6   : > { %962 = vmatpush3.msra.mxu1 %v503_v33  ;;  %963 = vmatprep.mubr.msk.f32.mxu1 %vm1027_vm1, %v1026_v32 }
  0xe7   : > { %1001 = vmatprep.subr.mxu1 %v1026_v32 }
 0x1a5   : > { %v960_v34 = vpop.f32.mrf.mxu1 }
 0x1a6   : > { %v493_v36 = vsel %vm491_vm2, %v960_v34, 0.0 }
 0x1a7   : > { %v482_v35 = vpop.f32.mrf.mxu1 }
 0x1a8   : > { %v492_v37 = vsel %vm491_vm2, %v482_v35, 0.0 }
 0x1a9   : > { %v494_v38 = vadd.f32 %v493_v36, %v492_v37 }
 0x1ab   : > { %v495_v39 = vrot.slane %v494_v38, 4 }
 0x1ad   : > { %v496_v40 = vadd.f32 %v495_v39, %v494_v38 }
 0x1af   : > { %v497_v41 = vrot.slane %v496_v40, 2 }
 0x1b1   : > { %v498_v42 = vadd.f32 %v497_v41, %v496_v40 }
 0x1b3   : > { %v499_v43 = vrot.slane %v498_v42, 1 }
 0x1b5   : > { %v500_v44 = vadd.f32 %v499_v43, %v498_v42 }
 0x1b7   : > { %v502_v45 = vmul.f32 0.0625, %v500_v44 }
 0x1b9   : > { %964 = vmatmul.mubr.msk.f32.vlgmr.msra.gmra.mxu1 %vm491_vm2, %v502_v45 }
 0x1ba   : > { %1002 = vmatpush3.msra.mxu1 %v503_v33  ;;  %1003 = vmatprep.mubr.msk.f32.mxu1 %vm1027_vm1, %v1026_v32 }
 0x279   : > { %v573_v49 = vpop.f32.mrf.mxu1 }
 0x27a   : > { %v580_v50 = vrot.slane %v573_v49, %v579_v48 }
 0x27b   : > { %v965_v51 = vpop.f32.mrf.mxu1 }
 0x27c   : > { %v581_v52 = vsub.f32 %v392_v30, %v580_v50  ;;  %v582_v53 = vsub.f32 %v397_v31, %v580_v50 }
 0x27e   : > { %v584_v54 = vmul.f32 %v582_v53, %v582_v53  ;;  %v583_v55 = vmul.f32 %v581_v52, %v581_v52 }
 0x280   : > { %998 = vmatprep.mubr.f32.mxu0 %v583_v55 }
 0x281   : > { %999 = vmatmul.mubr.f32.vlgmr.msra.gmra.mxu0 %v584_v54 }
 0x341   : > { %v1000_v56 = vpop.f32.mrf.mxu0 }
 0x342   : > { %v661_v58 = vsel %vm491_vm2, %v1000_v56, 0.0 }
 0x343   : > { %v651_v57 = vpop.f32.mrf.mxu0 }
 0x344   : > { %v660_v59 = vsel %vm491_vm2, %v651_v57, 0.0 }
 0x345   : > { %v662_v60 = vadd.f32 %v661_v58, %v660_v59 }
 0x347   : > { %v663_v61 = vrot.slane %v662_v60, 4 }
 0x349   : > { %v664_v62 = vadd.f32 %v663_v61, %v662_v60 }
 0x34b   : > { %v665_v63 = vrot.slane %v664_v62, 2 }
 0x34d   : > { %v666_v0 = vadd.f32 %v665_v63, %v664_v62 }
 0x34f   : > { %v667_v1 = vrot.slane %v666_v0, 1 }
 0x351   : > { %v668_v2 = vadd.f32 %v667_v1, %v666_v0 }
 0x353   : > { %v669_v3 = vmul.f32 0.0625, %v668_v2 }
 0x355   : > { %1004 = vmatmul.mubr.msk.f32.vlgmr.msra.gmra.mxu1 %vm491_vm2, %v669_v3 }
 0x415   : > { %v739_v4 = vpop.f32.mrf.mxu1 }
 0x416   : > { %v740_v5 = vadd.f32 1e-05, %v739_v4 }
 0x417   : > { %v1005_v6 = vpop.f32.mrf.mxu1 }
 0x418   : > { %1016 = vrsqrt.f32 %v740_v5 }
 0x425   : > { %v1017_v7 = vpop.eup %1016 }
 0x426   : > { %v747_v10 = vrot.slane %v1017_v7, %v579_v48 }
 0x428   : > { %v748_v12 = vmul.f32 %v747_v10, %v581_v52  ;;  %v749_v13 = vmul.f32 %v747_v10, %v582_v53 }
 0x42a   : > { %vm751_vm3 = vcmp.ge.f32.partialorder %v748_v12, 0.0  ;;  %vm752_vm4 = vcmp.ge.f32.partialorder %v749_v13, 0.0  ;;  %v754_v16 = vmul.f32 %v753_v11, %v748_v12  ;;  %v755_v17 = vmul.f32 %v753_v11, %v749_v13 }
 0x42c   : > { %v756_v18 = vsel %vm751_vm3, %v748_v12, %v754_v16  ;;  %v757_v19 = vsel %vm752_vm4, %v749_v13, %v755_v17 }
 0x42d   : > { %v762_v20 = vadd.f32 %v760_v14, %v756_v18  ;;  %v763_v21 = vadd.f32 %v761_v15, %v757_v19 }
 0x42f   : > { %764 = vst [vmem:[%s299_s19] sm:$0xff] %v762_v20  ;;  %765 = vst [vmem:[%s299_s19 + $0x8] sm:$0xff] %v763_v21 }
 0x430 PF: > { %s18_s26 = sadd.s32 1, %s1024_s26  }
 0x431   : > { %p15_p4 = scmp.ge.s32.totalorder %s18_s26, 4  }
 0x433   :  { %17 = sbr.rel (!%p15_p4) target bundleno = 2 (0x2), region = 81 }

// kernel: d_down_block.7
= control target key start
LH: loop header
LB: loop body
LE: loop exit
PB: predicated region body
PF: predicated region fallthrough
CT: control target
= control target key end

     0   :  { %s1151_s0 = inlined_call_operand.vmem [shape: f32[2,16,512], index: 0, kind: input, shape index: {}]   ;;  %s1152_s1 = inlined_call_operand.vmem [shape: f32[512,128], index: 1, kind: input, shape index: {}]   ;;  %s1153_s2 = inlined_call_operand.vmem [shape: f32[1,128], index: 2, kind: input, shape index: {}]   ;;  %s1154_s3 = inlined_call_operand.<no memory space> [shape: f32[1,1], index: 3, kind: input, shape index: {}]   ;;  %s1155_s4 = inlined_call_operand.vmem [shape: f32[2,16,128], index: 4, kind: input, shape index: {}]   ;;  %s1156_s5 = inlined_call_operand.hbm [shape: f32[2,16,128], index: 5, kind: output, shape index: {}]  }
   0x1   :  { %10 = sst [smem:[#allocation2]] %s1154_s3 }
   0x2   :  { %11 = vsyncpa [#allocation4], 0 }
   0x3   :  { %13 = vsyncpa [#allocation4 + $0x1], 0  ;;  %s835_s20 = smov 0   ;;  %s837_s21 = smov 0  }
   0x4   :  { %s839_s22 = smov 0   ;;  %s841_s23 = smov 0  }
   0x5 LB: > { %s856_s3 = sadd.s32 4294967295, %s797_s23   ;;  %s600_s24 = sadd.s32 4294967294, %s797_s23   ;;  %s797_s23 = sphi %s841_s23, %s1162_s23   ;;  %s793_s22 = sphi %s839_s22, %s1161_s22   ;;  %s789_s21 = sphi %s837_s21, %s1160_s21   ;;  %s785_s20 = sphi %s835_s20, %s1159_s20  }
   0x6   : > { %s860_s25 = sadd.s32 1, %s797_s23   ;;  %s141_s26 = sadd.s32 1, %s793_s22 }
   0x7   : > { %s138_s27 = ssub.s32 %s797_s23, %s860_s25  ;;  %p151_p0 = scmp.ne.s32.totalorder %s793_s22, %s789_s21 }
   0x8   : > { %p139_p1 = scmp.eq.s32.totalorder %s138_s27, 0  ;;  %p152_p2 = scmp.eq.s32.totalorder %s856_s3, 1 }
   0x9   : > { %p157_p3 = scmp.ne.s32.totalorder %s789_s21, %s785_s20  ;;  %p158_p4 = scmp.eq.s32.totalorder %s600_s24, 1 }
   0xa   : > { %s871_s28 = scalar_select %p139_p1, %s793_s22, %s141_s26  }
   0xb   : > { %p873_p5 = por %p152_p2, %p151_p0  ;;  %p877_p6 = por %p158_p4, %p157_p3 }
   0xc   : > { %p603_p7 = scmp.ge.s32.totalorder %s797_s23, 1  ;;  %p201_p8 = scmp.lt.s32.totalorder %s797_s23, 3 }
   0xe   : > { %p202_p9 = pnand %p603_p7, %p201_p8 }
   0xf   : > { %p234_p10 = scmp.lt.s32.totalorder (!%p202_p9), %s856_s3, 1  ;;  %s498_s7 = sld [smem:[#allocation2]] (!%p202_p9) }
  0x10   : > { %205 = sbr.rel (%p202_p9) target bundleno = 334 (0x14e), region = 40  ;;  %s617_s16 = sshll.u32 (!%p202_p9), %s856_s3, 8 }
  0x11   : > { %s1107_s19 = scalar_lea.hbm (!%p202_p9), %s1156_s5, %s617_s16  ;;  %s799_s26 = smov (!%p202_p9), [#allocation3]  }
  0x12   : > { %s741_s27 = sshll.u32 (!%p202_p9), %s799_s26, 4  ;;  %s742_s27 = int_to_ptr.vmem [resolvable:$false] %s741_s27 }
  0x13   : > { %s743_s6 = scalar_lea.vmem (!%p202_p9), %s742_s27, 512 }
  0x15   : > { %v283_v0 = vld [vmem:[%s1152_s1 + $0xf8] sm:$0xff]  ;;  %v282_v4 = vld [vmem:[%s1152_s1 + $0xf0] sm:$0xff]  ;;  %v281_v8 = vld [vmem:[%s1152_s1 + $0xe8] sm:$0xff]  ;;  %s1019_s9 = scalar_select %p234_p10, %s856_s3, 1 }
  0x16   : > { %v315_v1 = vld [vmem:[%s1152_s1 + $0x1f8] sm:$0xff]  ;;  %618 = vmatprep.subr.mxu0 %v283_v0  ;;  %v314_v5 = vld [vmem:[%s1152_s1 + $0x1f0] sm:$0xff]  ;;  %v313_v9 = vld [vmem:[%s1152_s1 + $0x1e8] sm:$0xff] }
  0x17   : > { %v267_v2 = vld [vmem:[%s1152_s1 + $0x78] sm:$0xff]  ;;  %656 = vmatprep.subr.mxu1 %v315_v1  ;;  %v266_v6 = vld [vmem:[%s1152_s1 + $0x70] sm:$0xff]  ;;  %v265_v10 = vld [vmem:[%s1152_s1 + $0x68] sm:$0xff]  ;;  %s615_s10 = sshll.u32 %s1019_s9, 6  ;;  %s616_s12 = sshll.u32 %s1019_s9, 4 }
  0x18   : > { %v299_v3 = vld [vmem:[%s1152_s1 + $0x178] sm:$0xff]  ;;  %619 = vmatpush3.msra.mxu0 %v267_v2  ;;  %v298_v7 = vld [vmem:[%s1152_s1 + $0x170] sm:$0xff]  ;;  %v297_v11 = vld [vmem:[%s1152_s1 + $0x168] sm:$0xff]  ;;  %s1067_s8 = scalar_lea.vmem %s1151_s0, %s615_s10  ;;  %s243_s15 = scalar_lea.vmem %s1155_s4, %s616_s12 }
  0x19   : > { %657 = vmatpush3.msra.mxu1 %v299_v3  ;;  %620 = vmatprep.subr.mxu0 %v282_v4  ;;  %v280_v12 = vld [vmem:[%s1152_s1 + $0xe0] sm:$0xff]  ;;  %v279_v16 = vld [vmem:[%s1152_s1 + $0xd8] sm:$0xff]  ;;  %v278_v20 = vld [vmem:[%s1152_s1 + $0xd0] sm:$0xff] }
  0x1a   : > { %658 = vmatprep.subr.mxu1 %v314_v5  ;;  %621 = vmatpush3.msra.mxu0 %v266_v6  ;;  %v312_v13 = vld [vmem:[%s1152_s1 + $0x1e0] sm:$0xff]  ;;  %v311_v17 = vld [vmem:[%s1152_s1 + $0x1d8] sm:$0xff]  ;;  %v310_v21 = vld [vmem:[%s1152_s1 + $0x1d0] sm:$0xff] }
  0x1b   : > { %659 = vmatpush3.msra.mxu1 %v298_v7  ;;  %622 = vmatprep.subr.mxu0 %v281_v8  ;;  %v264_v14 = vld [vmem:[%s1152_s1 + $0x60] sm:$0xff]  ;;  %v263_v18 = vld [vmem:[%s1152_s1 + $0x58] sm:$0xff]  ;;  %v262_v22 = vld [vmem:[%s1152_s1 + $0x50] sm:$0xff] }
  0x1c   : > { %660 = vmatprep.subr.mxu1 %v313_v9  ;;  %v296_v15 = vld [vmem:[%s1152_s1 + $0x160] sm:$0xff]  ;;  %623 = vmatpush3.msra.mxu0 %v265_v10  ;;  %v295_v19 = vld [vmem:[%s1152_s1 + $0x158] sm:$0xff]  ;;  %v294_v23 = vld [vmem:[%s1152_s1 + $0x150] sm:$0xff] }
  0x1d   : > { %661 = vmatpush3.msra.mxu1 %v297_v11  ;;  %624 = vmatprep.subr.mxu0 %v280_v12  ;;  %v277_v24 = vld [vmem:[%s1152_s1 + $0xc8] sm:$0xff]  ;;  %v276_v28 = vld [vmem:[%s1152_s1 + $0xc0] sm:$0xff]  ;;  %v275_v32 = vld [vmem:[%s1152_s1 + $0xb8] sm:$0xff] }
  0x1e   : > { %662 = vmatprep.subr.mxu1 %v312_v13  ;;  %625 = vmatpush3.msra.mxu0 %v264_v14  ;;  %v309_v25 = vld [vmem:[%s1152_s1 + $0x1c8] sm:$0xff]  ;;  %v308_v29 = vld [vmem:[%s1152_s1 + $0x1c0] sm:$0xff]  ;;  %v307_v33 = vld [vmem:[%s1152_s1 + $0x1b8] sm:$0xff] }
  0x1f   : > { %663 = vmatpush3.msra.mxu1 %v296_v15  ;;  %626 = vmatprep.subr.mxu0 %v279_v16  ;;  %v261_v26 = vld [vmem:[%s1152_s1 + $0x48] sm:$0xff]  ;;  %v260_v30 = vld [vmem:[%s1152_s1 + $0x40] sm:$0xff]  ;;  %v259_v34 = vld [vmem:[%s1152_s1 + $0x38] sm:$0xff] }
  0x20   : > { %664 = vmatprep.subr.mxu1 %v311_v17  ;;  %627 = vmatpush3.msra.mxu0 %v263_v18  ;;  %v293_v27 = vld [vmem:[%s1152_s1 + $0x148] sm:$0xff]  ;;  %v292_v31 = vld [vmem:[%s1152_s1 + $0x140] sm:$0xff]  ;;  %v291_v35 = vld [vmem:[%s1152_s1 + $0x138] sm:$0xff] }
  0x21   : > { %665 = vmatpush3.msra.mxu1 %v295_v19  ;;  %628 = vmatprep.subr.mxu0 %v278_v20  ;;  %v274_v36 = vld [vmem:[%s1152_s1 + $0xb0] sm:$0xff]  ;;  %v273_v40 = vld [vmem:[%s1152_s1 + $0xa8] sm:$0xff]  ;;  %v272_v44 = vld [vmem:[%s1152_s1 + $0xa0] sm:$0xff] }
  0x22   : > { %666 = vmatprep.subr.mxu1 %v310_v21  ;;  %629 = vmatpush3.msra.mxu0 %v262_v22  ;;  %v306_v37 = vld [vmem:[%s1152_s1 + $0x1b0] sm:$0xff]  ;;  %v305_v41 = vld [vmem:[%s1152_s1 + $0x1a8] sm:$0xff]  ;;  %v304_v45 = vld [vmem:[%s1152_s1 + $0x1a0] sm:$0xff] }
  0x23   : > { %667 = vmatpush3.msra.mxu1 %v294_v23  ;;  %630 = vmatprep.subr.mxu0 %v277_v24  ;;  %v258_v38 = vld [vmem:[%s1152_s1 + $0x30] sm:$0xff]  ;;  %v257_v42 = vld [vmem:[%s1152_s1 + $0x28] sm:$0xff]  ;;  %v256_v46 = vld [vmem:[%s1152_s1 + $0x20] sm:$0xff] }
  0x24   : > { %668 = vmatprep.subr.mxu1 %v309_v25  ;;  %631 = vmatpush3.msra.mxu0 %v261_v26  ;;  %v290_v39 = vld [vmem:[%s1152_s1 + $0x130] sm:$0xff]  ;;  %v289_v43 = vld [vmem:[%s1152_s1 + $0x128] sm:$0xff]  ;;  %v288_v47 = vld [vmem:[%s1152_s1 + $0x120] sm:$0xff] }
  0x25   : > { %669 = vmatpush3.msra.mxu1 %v293_v27  ;;  %632 = vmatprep.subr.mxu0 %v276_v28  ;;  %v271_v48 = vld [vmem:[%s1152_s1 + $0x98] sm:$0xff]  ;;  %v270_v52 = vld [vmem:[%s1152_s1 + $0x90] sm:$0xff]  ;;  %v269_v56 = vld [vmem:[%s1152_s1 + $0x88] sm:$0xff] }
  0x26   : > { %670 = vmatprep.subr.mxu1 %v308_v29  ;;  %633 = vmatpush3.msra.mxu0 %v260_v30  ;;  %v303_v49 = vld [vmem:[%s1152_s1 + $0x198] sm:$0xff]  ;;  %v302_v53 = vld [vmem:[%s1152_s1 + $0x190] sm:$0xff]  ;;  %v301_v57 = vld [vmem:[%s1152_s1 + $0x188] sm:$0xff] }
  0x27   : > { %671 = vmatpush3.msra.mxu1 %v292_v31  ;;  %634 = vmatprep.subr.mxu0 %v275_v32  ;;  %v255_v50 = vld [vmem:[%s1152_s1 + $0x18] sm:$0xff]  ;;  %v254_v54 = vld [vmem:[%s1152_s1 + $0x10] sm:$0xff]  ;;  %v253_v58 = vld [vmem:[%s1152_s1 + $0x8] sm:$0xff] }
  0x28   : > { %672 = vmatprep.subr.mxu1 %v307_v33  ;;  %635 = vmatpush3.msra.mxu0 %v259_v34  ;;  %v287_v51 = vld [vmem:[%s1152_s1 + $0x118] sm:$0xff]  ;;  %v286_v55 = vld [vmem:[%s1152_s1 + $0x110] sm:$0xff]  ;;  %v285_v59 = vld [vmem:[%s1152_s1 + $0x108] sm:$0xff] }
  0x29   : > { %673 = vmatpush3.msra.mxu1 %v291_v35  ;;  %636 = vmatprep.subr.mxu0 %v274_v36  ;;  %v268_v60 = vld [vmem:[%s1152_s1 + $0x80] sm:$0xff]  ;;  %v245_v63 = vld [vmem:[%s1067_s8 + $0x8] sm:$0xff]  ;;  %v247_v1 = vld [vmem:[%s1067_s8 + $0x18] sm:$0xff] }
  0x2a   : > { %674 = vmatprep.subr.mxu1 %v306_v37  ;;  %637 = vmatpush3.msra.mxu0 %v258_v38  ;;  %v300_v61 = vld [vmem:[%s1152_s1 + $0x180] sm:$0xff]  ;;  %v246_v3 = vld [vmem:[%s1067_s8 + $0x10] sm:$0xff]  ;;  %v249_v4 = vld [vmem:[%s1067_s8 + $0x28] sm:$0xff] }
  0x2b   : > { %675 = vmatpush3.msra.mxu1 %v290_v39  ;;  %638 = vmatprep.subr.mxu0 %v273_v40  ;;  %v252_v62 = vld [vmem:[%s1152_s1] sm:$0xff]  ;;  %v251_v5 = vld [vmem:[%s1067_s8 + $0x38] sm:$0xff]  ;;  %v250_v7 = vld [vmem:[%s1067_s8 + $0x30] sm:$0xff] }
  0x2c   : > { %676 = vmatprep.subr.mxu1 %v305_v41  ;;  %639 = vmatpush3.msra.mxu0 %v257_v42  ;;  %v284_v0 = vld [vmem:[%s1152_s1 + $0x100] sm:$0xff] }
  0x2d   : > { %677 = vmatpush3.msra.mxu1 %v289_v43  ;;  %640 = vmatprep.subr.mxu0 %v272_v44  ;;  %v244_v2 = vld [vmem:[%s1067_s8] sm:$0xff] }
  0x2e   : > { %678 = vmatprep.subr.mxu1 %v304_v45  ;;  %641 = vmatpush3.msra.mxu0 %v256_v46  ;;  %v248_v6 = vld [vmem:[%s1067_s8 + $0x20] sm:$0xff]  ;;  %s231_s8 = sand.u32 1, %s789_s21  }
  0x2f   : > { %679 = vmatpush3.msra.mxu1 %v288_v47  ;;  %642 = vmatprep.subr.mxu0 %v271_v48  ;;  %v609_v13 = vld [vmem:[%s1153_s2] ss:$0 sm:$0xff]  ;;  %s604_s11 = sshll.u32 %s231_s8, 4  ;;  %v501_v47 = vstv %s498_s7  ;;  %s1111_s3 = scalar_lea.sflag [#allocation4], %s231_s8 }
  0x30   : > { %680 = vmatprep.subr.mxu1 %v303_v49  ;;  %643 = vmatpush3.msra.mxu0 %v255_v50  ;;  %s233_s10 = scalar_lea.vmem [#allocation3], %s604_s11 }
  0x31   : > { %681 = vmatpush3.msra.mxu1 %v287_v51  ;;  %644 = vmatprep.subr.mxu0 %v270_v52  ;;  %s526_s17 = sshll.u32 %s233_s10, 4  ;;  %v507_v52 = vld [vmem:[%s243_s15 + $0x8] sm:$0xff]  ;;  %s1109_s17 = int_to_ptr.vmem [resolvable:$true] %s526_s17 }
  0x32   : > { %682 = vmatprep.subr.mxu1 %v302_v53  ;;  %645 = vmatpush3.msra.mxu0 %v254_v54  ;;  %v506_v53 = vld [vmem:[%s243_s15] sm:$0xff]  ;;  %s737_s24 = scalar_lea.vmem %s1109_s17, 256  ;;  %p744_p0 = scmp.lt.s32.totalorder %s1109_s17, %s742_s27 }
  0x33   : > { %683 = vmatpush3.msra.mxu1 %v286_v55  ;;  %646 = vmatprep.subr.mxu0 %v269_v56  ;;  %p738_p11 = scmp.ne.s32.totalorder %s1109_s17, %s737_s24  ;;  %p745_p1 = scmp.lt.s32.totalorder %s743_s6, %s737_s24 }
  0x34   : > { %684 = vmatprep.subr.mxu1 %v301_v57  ;;  %647 = vmatpush3.msra.mxu0 %v253_v58 }
  0x35   : > { %685 = vmatpush3.msra.mxu1 %v285_v59  ;;  %648 = vmatprep.subr.mxu0 %v268_v60  ;;  %p739_p12 = pnand %p738_p11, %p873_p5  ;;  %p746_p2 = por %p745_p1, %p744_p0 }
  0x36   : > { %686 = vmatprep.subr.mxu1 %v300_v61  ;;  %649 = vmatpush3.msra.mxu0 %v252_v62 }
  0x37   : > { %387 = vmatprep.mubr.f32.mxu0 %v245_v63  ;;  %687 = vmatpush3.msra.mxu1 %v284_v0  ;;  %p740_p13 = pneg %p739_p12 }
  0x38   : > { %462 = vmatprep.mubr.f32.mxu1 %v247_v1  ;;  %388 = vmatmul.mubr.f32.vlgmr.msra.gmra.mxu0 %v244_v2 }
  0x39   : > { %463 = vmatmul.mubr.f32.vlgmr.msra.gmra.mxu1 %v246_v3  ;;  %392 = vmatprep.mubr.f32.mxu0 %v249_v4  ;;  %p747_p3 = pnand %p746_p2, %p740_p13 }
  0x3a   : > { %467 = vmatprep.mubr.f32.mxu1 %v251_v5 }
  0x3c   : > { %393 = vmatmul.mubr.f32.gmra.mxu0 %v248_v6 }
  0x3d   : > { %468 = vmatmul.mubr.f32.gmra.mxu1 %v250_v7 }
  0xf8   : > { %v650_v8 = vpop.f32.mrf.mxu0 }
  0xf9   : > { %v688_v9 = vpop.f32.mrf.mxu1 }
  0xfa   : > { %v651_v10 = vpop.f32.mrf.mxu0 }
  0xfb   : > { %v689_v11 = vpop.f32.mrf.mxu1  ;;  %v652_v12 = vadd.f32 %v651_v10, %v650_v8 }
  0xfc   : > { %v653_v14 = vpop.f32.mrf.mxu0  ;;  %v690_v20 = vadd.f32 %v689_v11, %v688_v9 }
  0xfd   : > { %v691_v15 = vpop.f32.mrf.mxu1  ;;  %v390_v18 = vadd.f32 %v652_v12, %v609_v13 }
  0xfe   : > { %v654_v16 = vpop.f32.mrf.mxu0 }
  0xff   : > { %v692_v17 = vpop.f32.mrf.mxu1  ;;  %v655_v19 = vadd.f32 %v654_v16, %v653_v14  ;;  %v465_v23 = vadd.f32 %v690_v20, %v390_v18 }
 0x100   : > { %v693_v22 = vadd.f32 %v692_v17, %v691_v15 }
 0x101   : > { %v395_v21 = vadd.f32 %v655_v19, %v609_v13 }
 0x103   : > { %v470_v24 = vadd.f32 %v693_v22, %v395_v21 }
 0x105   : > { %v473_v25 = vadd.f32 %v470_v24, %v465_v23 }
 0x107   : > { %v474_v26 = vrot.slane %v473_v25, 4 }
 0x109   : > { %v475_v27 = vadd.f32 %v474_v26, %v473_v25 }
 0x10b   : > { %v476_v28 = vrot.slane %v475_v27, 2 }
 0x10d   : > { %v477_v29 = vadd.f32 %v476_v28, %v475_v27 }
 0x10f   : > { %v478_v30 = vrot.slane %v477_v29, 1 }
 0x111   : > { %v479_v31 = vadd.f32 %v478_v30, %v477_v29 }
 0x113   : > { %v481_v32 = vmul.f32 0.0625, %v479_v31 }
 0x115   : > { %v482_v33 = vsub.f32 %v465_v23, %v481_v32  ;;  %v483_v34 = vsub.f32 %v470_v24, %v481_v32 }
 0x117   : > { %v484_v35 = vmul.f32 %v482_v33, %v482_v33  ;;  %v485_v36 = vmul.f32 %v483_v34, %v483_v34 }
 0x119   : > { %v486_v37 = vadd.f32 %v485_v36, %v484_v35 }
 0x11b   : > { %v487_v38 = vrot.slane %v486_v37, 4 }
 0x11d   : > { %v488_v39 = vadd.f32 %v487_v38, %v486_v37 }
 0x11f   : > { %v489_v40 = vrot.slane %v488_v39, 2 }
 0x121   : > { %v490_v41 = vadd.f32 %v489_v40, %v488_v39 }
 0x123   : > { %v491_v42 = vrot.slane %v490_v41, 1 }
 0x125   : > { %v492_v43 = vadd.f32 %v491_v42, %v490_v41 }
 0x127   : > { %v493_v44 = vmul.f32 0.0625, %v492_v43 }
 0x129   : > { %v494_v45 = vadd.f32 1e-05, %v493_v44 }
 0x12b   : > { %735 = vrsqrt.f32 %v494_v45 }
 0x138   : > { %v736_v46 = vpop.eup %735 }
 0x139   : > { %v496_v48 = vmul.f32 %v736_v46, %v482_v33  ;;  %v497_v49 = vmul.f32 %v736_v46, %v483_v34 }
 0x13b   : > { %vm499_vm0 = vcmp.ge.f32.partialorder %v496_v48, 0.0  ;;  %vm500_vm1 = vcmp.ge.f32.partialorder %v497_v49, 0.0  ;;  %v502_v50 = vmul.f32 %v501_v47, %v496_v48  ;;  %v503_v51 = vmul.f32 %v501_v47, %v497_v49 }
 0x13d   : > { %v505_v54 = vsel %vm500_vm1, %v497_v49, %v503_v51  ;;  %v504_v55 = vsel %vm499_vm0, %v496_v48, %v502_v50 }
 0x13e   : > { %v509_v56 = vadd.f32 %v507_v52, %v505_v54  ;;  %v508_v57 = vadd.f32 %v506_v53, %v504_v55 }
 0x140   : > { %510 = vst [vmem:[%s233_s10] sm:$0xff] %v508_v57  ;;  %511 = vst [vmem:[%s233_s10 + $0x8] sm:$0xff] %v509_v56 }
 0x141   : > { %750 = shalt.err (!%p747_p3)
}
 0x142   : > { %s751_s7 = scalar_lea.hbm %s1107_s19, 256  ;;  %s755_s12 = scalar_lea.hbm %s1156_s5, 512 }
 0x143   : > { %p752_p4 = scmp.ne.s32.totalorder %s1107_s19, %s751_s7  ;;  %p756_p9 = scmp.lt.s32.totalorder %s1107_s19, %s1156_s5 }
 0x144   : > { %p757_p10 = scmp.lt.s32.totalorder %s755_s12, %s751_s7 }
 0x145   : > { %p753_p7 = pnand %p752_p4, %p873_p5 }
 0x146   : > { %p758_p11 = por %p757_p10, %p756_p9 }
 0x147   : > { %p754_p8 = pneg %p753_p7 }
 0x149   : > { %p759_p12 = pnand %p758_p11, %p754_p8 }
 0x14b   : > { %762 = shalt.err (!%p759_p12)
}
 0x14c   : > { %s800_s15 = smov 128   ;;  %s801_s16 = smov 8  }
 0x14d   : > { %694 = dma.vmem_to_hbm [thread:$0]  (%p873_p5), %s1109_s17, 256, %s1107_s19, %s1111_s3, %s800_s15, %s800_s15, %s801_s16  }
 0x14e PF: > { %p700_p13 = scmp.ge.s32.totalorder %s797_s23, 2  ;;  %s541_s10 = sand.u32 1, %s785_s20  }
 0x14f   : > { %s542_s9 = scalar_lea.sflag [#allocation4], %s541_s10 }
 0x150   : > { %p697_p0 = pnand %p700_p13, %p877_p6 }
 0x152   : > { %p698_p1 = pneg %p697_p0 }
 0x154   : > { %780 = dma.done.wait (%p698_p1), %s542_s9, 256  }
 0x155   : > { %782 = vsyncadd (%p698_p1), %s542_s9, 4294967040  ;;  %p16_p2 = scmp.ge.s32.totalorder %s860_s25, 4   ;;  %s1159_s20 = smov %s789_s21 }
 0x156   : > { %s1160_s21 = smov %s793_s22  ;;  %s1161_s22 = smov %s871_s28 }
 0x157   : > { %s1162_s23 = smov %s860_s25  ;;  %18 = sbr.rel (!%p16_p2) target bundleno = 5 (0x5), region = 78 }
 0x15c   :  { %547 = vsyncpa [#allocation4], 1 }
 0x15d   :  { %549 = vsyncpa [#allocation4 + $0x1], 1 }

</bundles_post_ra>
